<compile_context>
chip_gen: v7x
topology: tpu7x:2x2x1
jax: 0.10.0
libtpu: 0.0.40
codegen_flags: <defaults>
</compile_context>

<pallas_src>
import functools

import jax
import jax.numpy as jnp
from jax.experimental import pallas as pl
from jax.experimental.pallas import tpu as pltpu

BN_EPS = 1e-5


# ---------------------------------------------------------------------------
# In-kernel helpers
# ---------------------------------------------------------------------------
def _zero_halo_border(pad):
    """Zero only the 1-element halo border of a (Hh+2, Wh+2, C) pad buffer."""
    Hp, Wp, C = pad.shape
    zrow = jnp.zeros((1, Wp, C), pad.dtype)
    pad[0:1, :, :] = zrow
    pad[Hp - 1:Hp, :, :] = zrow
    zcol = jnp.zeros((Hp, 1, C), pad.dtype)
    pad[:, 0:1, :] = zcol
    pad[:, Wp - 1:Wp, :] = zcol


def _conv3x3_im2col(pad, col, w_ref, Hh, Wh, mm_dtype):
    """3x3 conv as ONE MXU dot with K = 9*C (im2col staged in bf16 scratch)."""
    C = pad.shape[-1]
    for k in range(9):
        dy, dx = divmod(k, 3)
        col[:, k * C:(k + 1) * C] = (
            pad[dy:dy + Hh, dx:dx + Wh, :].reshape(Hh * Wh, C).astype(mm_dtype))
    return jnp.dot(col[...], w_ref[...], preferred_element_type=jnp.float32)


def _conv3x3_acc9(pad, w_ref, Hh, Wh, mm_dtype):
    """3x3 conv as 9 accumulating MXU dots (no im2col scratch; v7x-friendly)."""
    C = pad.shape[-1]
    acc = None
    for k in range(9):
        dy, dx = divmod(k, 3)
        patch = pad[dy:dy + Hh, dx:dx + Wh, :].reshape(Hh * Wh, C).astype(mm_dtype)
        t = jnp.dot(patch, w_ref[k], preferred_element_type=jnp.float32)
        acc = t if acc is None else acc + t
    return acc


# ---------------------------------------------------------------------------
# Fused kernel: maxpool(2) -> (conv3x3 + folded BN + ReLU) x 2
# One grid step processes one image (NHWC inside the kernel).
# ---------------------------------------------------------------------------
def _down_fused_kernel(x_ref, w1_ref, b1_ref, w2_ref, b2_ref, o_ref,
                       rbuf, pad1, pad2, *cols, use_im2col):
    H, W, Cin = x_ref.shape
    Hh, Wh = H // 2, W // 2
    Cmid = b1_ref.shape[-1]
    mm_dtype = w1_ref.dtype

    # ---- 2x2 max pool (each access strides a single dim: known-safe layout) ----
    rbuf[...] = jnp.maximum(x_ref[pl.ds(0, Hh, 2), :, :],
                            x_ref[pl.ds(1, Hh, 2), :, :])          # (Hh, W, Cin)
    pooled = jnp.maximum(rbuf[:, pl.ds(0, Wh, 2), :],
                         rbuf[:, pl.ds(1, Wh, 2), :])              # (Hh, Wh, Cin)

    # ---- conv1 + folded BN + ReLU ----
    _zero_halo_border(pad1)                 # border only; interior overwritten below
    pad1[1:Hh + 1, 1:Wh + 1, :] = pooled
    if use_im2col:
        y1 = _conv3x3_im2col(pad1, cols[0], w1_ref, Hh, Wh, mm_dtype)
    else:
        y1 = _conv3x3_acc9(pad1, w1_ref, Hh, Wh, mm_dtype)
    y1 = jnp.maximum(y1 + b1_ref[...], 0.0)                        # f32 epilogue

    # ---- conv2 + folded BN + ReLU ----
    _zero_halo_border(pad2)
    # Single lane-dense store (free sublane split: Wh is a multiple of 8).
    pad2[1:Hh + 1, 1:Wh + 1, :] = y1.reshape(Hh, Wh, Cmid)
    if use_im2col:
        y2 = _conv3x3_im2col(pad2, cols[1], w2_ref, Hh, Wh, mm_dtype)
    else:
        y2 = _conv3x3_acc9(pad2, w2_ref, Hh, Wh, mm_dtype)
    y2 = jnp.maximum(y2 + b2_ref[...], 0.0)                        # (Hh*Wh, Cout)

    o_ref[...] = y2.astype(o_ref.dtype)


# ---------------------------------------------------------------------------
# Parameter construction (deterministic) and BN folding.
# ---------------------------------------------------------------------------
def init_down_params(key, in_channels, out_channels):
    mid_channels = out_channels  # DoubleConv default: mid = out
    keys = jax.random.split(key, 12)

    def conv_init(kw, kb, cin, cout):
        fan_in = cin * 9
        w = jax.random.normal(kw, (3, 3, cin, cout), jnp.float32) / jnp.sqrt(fan_in)
        b = 0.1 * jax.random.normal(kb, (cout,), jnp.float32)
        return w, b

    def bn_init(kg, kb, km, kv, c):
        gamma = 1.0 + 0.1 * jax.random.normal(kg, (c,), jnp.float32)
        beta = 0.1 * jax.random.normal(kb, (c,), jnp.float32)
        mean = 0.1 * jax.random.normal(km, (c,), jnp.float32)
        var = jnp.abs(jax.random.normal(kv, (c,), jnp.float32)) + 0.5
        return gamma, beta, mean, var

    w1, b1 = conv_init(keys[0], keys[1], in_channels, mid_channels)
    g1, be1, m1, v1 = bn_init(keys[2], keys[3], keys[4], keys[5], mid_channels)
    w2, b2 = conv_init(keys[6], keys[7], mid_channels, out_channels)
    g2, be2, m2, v2 = bn_init(keys[8], keys[9], keys[10], keys[11], out_channels)

    return {
        "conv1": (w1, b1), "bn1": (g1, be1, m1, v1),
        "conv2": (w2, b2), "bn2": (g2, be2, m2, v2),
    }


def _pick_vmem_limit(H, W, Hh, Wh, Cin, Cmid, Cout, strategy, mm_itemsize):
    f32 = 4
    scratch = Hh * W * Cin * f32                                   # rbuf
    scratch += (Hh + 2) * (Wh + 2) * (Cin + Cmid) * f32            # pad1 + pad2
    if strategy == "im2col":
        scratch += Hh * Wh * 9 * (Cin + Cmid) * mm_itemsize        # col1 + col2 (bf16)
    blocks = 2 * H * W * Cin * f32 + 2 * Hh * Wh * Cout * f32      # double-buffered I/O
    weights = 9 * (Cin * Cmid + Cmid * Cout) * mm_itemsize + (Cmid + Cout) * f32
    need = scratch + blocks + weights
    try:  # stay under physical VMEM (64 MiB on v7x, 128 MiB on v5e/v6e)
        cap = int(pltpu.get_tpu_info().vmem_capacity_bytes * 0.85)
    except Exception:
        cap = 100 * 1024 * 1024
    return int(max(min(2 * need + (8 << 20), cap), 32 << 20))


# ---------------------------------------------------------------------------
# Full Down.forward
# ---------------------------------------------------------------------------
def down_forward(x_nchw, params, *, conv_strategy=None, matmul_dtype=jnp.bfloat16):
    N, Cin, H, W = x_nchw.shape
    assert H % 2 == 0 and W % 2 == 0, "kernel assumes even spatial dims"
    Hh, Wh = H // 2, W // 2
    assert Wh % 8 == 0, "in-kernel reshapes assume Wh % 8 == 0"  # TODO(synk): general Wh

    w1, b1 = params["conv1"]
    g1, be1, m1, v1 = params["bn1"]
    w2, b2 = params["conv2"]
    g2, be2, m2, v2 = params["bn2"]
    Cmid, Cout = w1.shape[-1], w2.shape[-1]
    itemsize = jnp.dtype(matmul_dtype).itemsize

    if conv_strategy is None:
        col_bytes = Hh * Wh * 9 * (Cin + Cmid) * itemsize
        conv_strategy = "im2col" if col_bytes <= (24 << 20) else "acc9"
    if conv_strategy not in ("im2col", "acc9"):
        raise ValueError(conv_strategy)

    # Fold BN (eval mode) into the weights (scale) and bias.
    s1 = g1 / jnp.sqrt(v1 + BN_EPS)
    s2 = g2 / jnp.sqrt(v2 + BN_EPS)
    bb1 = (b1 - m1) * s1 + be1
    bb2 = (b2 - m2) * s2 + be2
    w1f = (w1 * s1).astype(matmul_dtype)        # (3,3,Cin,Cmid), rows order (dy,dx,cin)
    w2f = (w2 * s2).astype(matmul_dtype)

    if conv_strategy == "im2col":
        w1k = w1f.reshape(9 * Cin, Cmid)
        w2k = w2f.reshape(9 * Cmid, Cout)
        w1_spec = pl.BlockSpec((9 * Cin, Cmid), lambda n: (0, 0))
        w2_spec = pl.BlockSpec((9 * Cmid, Cout), lambda n: (0, 0))
        extra_scratch = [pltpu.VMEM((Hh * Wh, 9 * Cin), matmul_dtype),   # col1
                         pltpu.VMEM((Hh * Wh, 9 * Cmid), matmul_dtype)]  # col2
    else:  # acc9: no im2col scratch at all
        w1k = w1f.reshape(9, Cin, Cmid)
        w2k = w2f.reshape(9, Cmid, Cout)
        w1_spec = pl.BlockSpec((9, Cin, Cmid), lambda n: (0, 0, 0))
        w2_spec = pl.BlockSpec((9, Cmid, Cout), lambda n: (0, 0, 0))
        extra_scratch = []

    # TODO(synk): keep the model NHWC end-to-end and drop this HBM transpose.
    x = jnp.transpose(x_nchw, (0, 2, 3, 1))            # NCHW -> NHWC

    scratch = [pltpu.VMEM((Hh, W, Cin), jnp.float32),             # rbuf (row max)
               pltpu.VMEM((Hh + 2, Wh + 2, Cin), jnp.float32),    # pad1 (halo)
               pltpu.VMEM((Hh + 2, Wh + 2, Cmid), jnp.float32),   # pad2 (halo)
               ] + extra_scratch

    vmem_limit = _pick_vmem_limit(H, W, Hh, Wh, Cin, Cmid, Cout, conv_strategy, itemsize)
    kernel = functools.partial(_down_fused_kernel,
                               use_im2col=(conv_strategy == "im2col"))

    out = pl.pallas_call(
        kernel,
        out_shape=jax.ShapeDtypeStruct((N, Hh * Wh, Cout), jnp.float32),
        grid_spec=pltpu.PrefetchScalarGridSpec(
            num_scalar_prefetch=0,
            grid=(N,),
            in_specs=[
                pl.BlockSpec((None, H, W, Cin), lambda n: (n, 0, 0, 0)),
                w1_spec,
                pl.BlockSpec((1, Cmid), lambda n: (0, 0)),
                w2_spec,
                pl.BlockSpec((1, Cout), lambda n: (0, 0)),
            ],
            out_specs=pl.BlockSpec((None, Hh * Wh, Cout), lambda n: (n, 0, 0)),
            scratch_shapes=scratch,
        ),
        compiler_params=pltpu.CompilerParams(
            dimension_semantics=("parallel",),
            vmem_limit_bytes=vmem_limit,
        ),
    )(x, w1k, bb1.reshape(1, Cmid), w2k, bb2.reshape(1, Cout))

    out = out.reshape(N, Hh, Wh, Cout)                 # contiguous (free) reshape
    return jnp.transpose(out, (0, 3, 1, 2))            # NHWC -> NCHW


# ---------------------------------------------------------------------------
# Pure-JAX reference.
#   operand_dtype=float32  -> PyTorch eval-mode semantics (gold reference).
#   operand_dtype=bfloat16 -> mirrors the kernel's numerics (bf16 matmul
#     operands, BN folded into weights, f32 accumulation) for a tight check.
# ---------------------------------------------------------------------------
def reference_down(x_nchw, params, operand_dtype=jnp.float32):
    x = jax.lax.reduce_window(x_nchw, -jnp.inf, jax.lax.max,
                              (1, 1, 2, 2), (1, 1, 2, 2), "VALID")

    def block(x, conv, bn):
        w_hwio, b = conv
        gamma, beta, mean, var = bn
        scale = gamma / jnp.sqrt(var + BN_EPS)
        w = (w_hwio * scale).astype(operand_dtype).astype(jnp.float32)
        bias = (b - mean) * scale + beta
        w_oihw = jnp.transpose(w, (3, 2, 0, 1))
        y = jax.lax.conv_general_dilated(
            x.astype(operand_dtype).astype(jnp.float32), w_oihw, (1, 1), "SAME",
            dimension_numbers=("NCHW", "OIHW", "NCHW"),
            precision=jax.lax.Precision.HIGHEST)
        return jnp.maximum(y + bias[None, :, None, None], 0.0)

    x = block(x, params["conv1"], params["bn1"])
    x = block(x, params["conv2"], params["bn2"])
    return x


if __name__ == "__main__":
    key = jax.random.PRNGKey(0)
    k_x, k_p = jax.random.split(key)

    in_channels, out_channels = 4, 8
    x = jax.random.normal(k_x, (2, in_channels, 16, 16), jnp.float32)  # NCHW
    params = init_down_params(k_p, in_channels, out_channels)

    ref_f32 = jax.block_until_ready(reference_down(x, params))                  # eval-mode gold
    ref_bf16 = jax.block_until_ready(reference_down(x, params, jnp.bfloat16))   # kernel-numerics

    # Exercise both conv strategies (im2col: v5e/v6e default; acc9: v7x VMEM-lean variant).
    for strategy in ("im2col", "acc9"):
        out = jax.block_until_ready(down_forward(x, params, conv_strategy=strategy))
        assert out.shape == (2, out_channels, 8, 8), out.shape
        tight = float(jnp.max(jnp.abs(out - ref_bf16)))
        loose = float(jnp.max(jnp.abs(out - ref_f32)))
        assert tight < 5e-3, f"{strategy}: max err vs bf16 reference {tight}"
        assert loose < 2e-1, f"{strategy}: max err vs f32 reference {loose}"

    print("KERNEL_OK")
</pallas_src>

<mosaic_0001>
module attributes {stable_mosaic.version = 11 : i64} {
  func.func @_down_fused_kernel(%arg0: i32, %arg1: memref<1x16x16x4xf32, #tpu.memory_space<vmem>>, %arg2: memref<36x8xbf16, #tpu.memory_space<vmem>>, %arg3: memref<1x8xf32, #tpu.memory_space<vmem>>, %arg4: memref<72x8xbf16, #tpu.memory_space<vmem>>, %arg5: memref<1x8xf32, #tpu.memory_space<vmem>>, %arg6: memref<1x64x8xf32, #tpu.memory_space<vmem>>, %arg7: memref<8x16x4xf32, #tpu.memory_space<vmem>>, %arg8: memref<10x10x4xf32, #tpu.memory_space<vmem>>, %arg9: memref<10x10x8xf32, #tpu.memory_space<vmem>>, %arg10: memref<64x36xbf16, #tpu.memory_space<vmem>>, %arg11: memref<64x72xbf16, #tpu.memory_space<vmem>>) attributes {dimension_semantics = [#tpu.dimension_semantics<parallel>], iteration_bounds = array<i64: 2>, scalar_prefetch = 0 : i64, scratch_operands = 5 : i64, tpu.core_type = #tpu.core_type<tc>, window_params = [{transform_indices = @transform_0, window_bounds = array<i64: 1, 16, 16, 4>}, {pipeline_mode = #tpu.pipeline_mode<synchronous>, transform_indices = @transform_1, window_bounds = array<i64: 36, 8>}, {pipeline_mode = #tpu.pipeline_mode<synchronous>, transform_indices = @transform_2, window_bounds = array<i64: 1, 8>}, {pipeline_mode = #tpu.pipeline_mode<synchronous>, transform_indices = @transform_3, window_bounds = array<i64: 72, 8>}, {pipeline_mode = #tpu.pipeline_mode<synchronous>, transform_indices = @transform_4, window_bounds = array<i64: 1, 8>}, {transform_indices = @transform_5, window_bounds = array<i64: 1, 64, 8>}]} {
    %c0 = arith.constant 0 : index
    %c0_0 = arith.constant 0 : index
    %c0_1 = arith.constant 0 : index
    %c0_2 = arith.constant 0 : index
    %0 = tpu.strided_load %arg1[%c0, %c0_0, %c0_1, %c0_2] {strides = array<i32: 1, 2, 1, 1>} : memref<1x16x16x4xf32, #tpu.memory_space<vmem>>, vector<1x8x16x4xf32>
    %1 = vector.shape_cast %0 : vector<1x8x16x4xf32> to vector<8x16x4xf32>
    %c0_3 = arith.constant 0 : index
    %c1 = arith.constant 1 : index
    %c0_4 = arith.constant 0 : index
    %c0_5 = arith.constant 0 : index
    %2 = tpu.strided_load %arg1[%c0_3, %c1, %c0_4, %c0_5] {strides = array<i32: 1, 2, 1, 1>} : memref<1x16x16x4xf32, #tpu.memory_space<vmem>>, vector<1x8x16x4xf32>
    %3 = vector.shape_cast %2 : vector<1x8x16x4xf32> to vector<8x16x4xf32>
    %4 = arith.maximumf %1, %3 : vector<8x16x4xf32>
    %c0_6 = arith.constant 0 : index
    %c0_7 = arith.constant 0 : index
    %c0_8 = arith.constant 0 : index
    %5 = vector.load %arg7[%c0_6, %c0_7, %c0_8] : memref<8x16x4xf32, #tpu.memory_space<vmem>>, vector<8x16x4xf32>
    tpu.vector_store %arg7[%c0_6, %c0_7, %c0_8], %4 {strides = array<i32>} : memref<8x16x4xf32, #tpu.memory_space<vmem>>, vector<8x16x4xf32>,
    %c0_9 = arith.constant 0 : index
    %c0_10 = arith.constant 0 : index
    %c0_11 = arith.constant 0 : index
    %6 = tpu.strided_load %arg7[%c0_9, %c0_10, %c0_11] {strides = array<i32: 1, 2, 1>} : memref<8x16x4xf32, #tpu.memory_space<vmem>>, vector<8x8x4xf32>
    %c0_12 = arith.constant 0 : index
    %c1_13 = arith.constant 1 : index
    %c0_14 = arith.constant 0 : index
    %7 = tpu.strided_load %arg7[%c0_12, %c1_13, %c0_14] {strides = array<i32: 1, 2, 1>} : memref<8x16x4xf32, #tpu.memory_space<vmem>>, vector<8x8x4xf32>
    %8 = arith.maximumf %6, %7 : vector<8x8x4xf32>
    %cst = arith.constant 0.000000e+00 : f32
    %9 = vector.broadcast %cst : f32 to vector<1x10x4xf32>
    %c0_15 = arith.constant 0 : index
    %c0_16 = arith.constant 0 : index
    %c0_17 = arith.constant 0 : index
    %10 = vector.load %arg8[%c0_15, %c0_16, %c0_17] : memref<10x10x4xf32, #tpu.memory_space<vmem>>, vector<1x10x4xf32>
    tpu.vector_store %arg8[%c0_15, %c0_16, %c0_17], %9 {strides = array<i32>} : memref<10x10x4xf32, #tpu.memory_space<vmem>>, vector<1x10x4xf32>,
    %c9 = arith.constant 9 : index
    %c0_18 = arith.constant 0 : index
    %c0_19 = arith.constant 0 : index
    %11 = vector.load %arg8[%c9, %c0_18, %c0_19] : memref<10x10x4xf32, #tpu.memory_space<vmem>>, vector<1x10x4xf32>
    tpu.vector_store %arg8[%c9, %c0_18, %c0_19], %9 {strides = array<i32>} : memref<10x10x4xf32, #tpu.memory_space<vmem>>, vector<1x10x4xf32>,
    %cst_20 = arith.constant 0.000000e+00 : f32
    %12 = vector.broadcast %cst_20 : f32 to vector<10x1x4xf32>
    %c0_21 = arith.constant 0 : index
    %c0_22 = arith.constant 0 : index
    %c0_23 = arith.constant 0 : index
    %13 = vector.load %arg8[%c0_21, %c0_22, %c0_23] : memref<10x10x4xf32, #tpu.memory_space<vmem>>, vector<10x1x4xf32>
    tpu.vector_store %arg8[%c0_21, %c0_22, %c0_23], %12 {strides = array<i32>} : memref<10x10x4xf32, #tpu.memory_space<vmem>>, vector<10x1x4xf32>,
    %c0_24 = arith.constant 0 : index
    %c9_25 = arith.constant 9 : index
    %c0_26 = arith.constant 0 : index
    %14 = vector.load %arg8[%c0_24, %c9_25, %c0_26] : memref<10x10x4xf32, #tpu.memory_space<vmem>>, vector<10x1x4xf32>
    tpu.vector_store %arg8[%c0_24, %c9_25, %c0_26], %12 {strides = array<i32>} : memref<10x10x4xf32, #tpu.memory_space<vmem>>, vector<10x1x4xf32>,
    %c1_27 = arith.constant 1 : index
    %c1_28 = arith.constant 1 : index
    %c0_29 = arith.constant 0 : index
    %15 = vector.load %arg8[%c1_27, %c1_28, %c0_29] : memref<10x10x4xf32, #tpu.memory_space<vmem>>, vector<8x8x4xf32>
    tpu.vector_store %arg8[%c1_27, %c1_28, %c0_29], %8 {strides = array<i32>} : memref<10x10x4xf32, #tpu.memory_space<vmem>>, vector<8x8x4xf32>,
    %c0_30 = arith.constant 0 : index
    %c0_31 = arith.constant 0 : index
    %c0_32 = arith.constant 0 : index
    %16 = vector.load %arg8[%c0_30, %c0_31, %c0_32] : memref<10x10x4xf32, #tpu.memory_space<vmem>>, vector<8x8x4xf32>
    %17 = vector.shape_cast %16 : vector<8x8x4xf32> to vector<64x4xf32>
    %18 = arith.truncf %17 : vector<64x4xf32> to vector<64x4xbf16>
    %c0_33 = arith.constant 0 : index
    %c0_34 = arith.constant 0 : index
    %19 = vector.load %arg10[%c0_33, %c0_34] : memref<64x36xbf16, #tpu.memory_space<vmem>>, vector<64x4xbf16>
    tpu.vector_store %arg10[%c0_33, %c0_34], %18 {strides = array<i32>} : memref<64x36xbf16, #tpu.memory_space<vmem>>, vector<64x4xbf16>,
    %c0_35 = arith.constant 0 : index
    %c1_36 = arith.constant 1 : index
    %c0_37 = arith.constant 0 : index
    %20 = vector.load %arg8[%c0_35, %c1_36, %c0_37] : memref<10x10x4xf32, #tpu.memory_space<vmem>>, vector<8x8x4xf32>
    %21 = vector.shape_cast %20 : vector<8x8x4xf32> to vector<64x4xf32>
    %22 = arith.truncf %21 : vector<64x4xf32> to vector<64x4xbf16>
    %c0_38 = arith.constant 0 : index
    %c4 = arith.constant 4 : index
    %23 = vector.load %arg10[%c0_38, %c4] : memref<64x36xbf16, #tpu.memory_space<vmem>>, vector<64x4xbf16>
    tpu.vector_store %arg10[%c0_38, %c4], %22 {strides = array<i32>} : memref<64x36xbf16, #tpu.memory_space<vmem>>, vector<64x4xbf16>,
    %c0_39 = arith.constant 0 : index
    %c2 = arith.constant 2 : index
    %c0_40 = arith.constant 0 : index
    %24 = vector.load %arg8[%c0_39, %c2, %c0_40] : memref<10x10x4xf32, #tpu.memory_space<vmem>>, vector<8x8x4xf32>
    %25 = vector.shape_cast %24 : vector<8x8x4xf32> to vector<64x4xf32>
    %26 = arith.truncf %25 : vector<64x4xf32> to vector<64x4xbf16>
    %c0_41 = arith.constant 0 : index
    %c8 = arith.constant 8 : index
    %27 = vector.load %arg10[%c0_41, %c8] : memref<64x36xbf16, #tpu.memory_space<vmem>>, vector<64x4xbf16>
    tpu.vector_store %arg10[%c0_41, %c8], %26 {strides = array<i32>} : memref<64x36xbf16, #tpu.memory_space<vmem>>, vector<64x4xbf16>,
    %c1_42 = arith.constant 1 : index
    %c0_43 = arith.constant 0 : index
    %c0_44 = arith.constant 0 : index
    %28 = vector.load %arg8[%c1_42, %c0_43, %c0_44] : memref<10x10x4xf32, #tpu.memory_space<vmem>>, vector<8x8x4xf32>
    %29 = vector.shape_cast %28 : vector<8x8x4xf32> to vector<64x4xf32>
    %30 = arith.truncf %29 : vector<64x4xf32> to vector<64x4xbf16>
    %c0_45 = arith.constant 0 : index
    %c12 = arith.constant 12 : index
    %31 = vector.load %arg10[%c0_45, %c12] : memref<64x36xbf16, #tpu.memory_space<vmem>>, vector<64x4xbf16>
    tpu.vector_store %arg10[%c0_45, %c12], %30 {strides = array<i32>} : memref<64x36xbf16, #tpu.memory_space<vmem>>, vector<64x4xbf16>,
    %c1_46 = arith.constant 1 : index
    %c1_47 = arith.constant 1 : index
    %c0_48 = arith.constant 0 : index
    %32 = vector.load %arg8[%c1_46, %c1_47, %c0_48] : memref<10x10x4xf32, #tpu.memory_space<vmem>>, vector<8x8x4xf32>
    %33 = vector.shape_cast %32 : vector<8x8x4xf32> to vector<64x4xf32>
    %34 = arith.truncf %33 : vector<64x4xf32> to vector<64x4xbf16>
    %c0_49 = arith.constant 0 : index
    %c16 = arith.constant 16 : index
    %35 = vector.load %arg10[%c0_49, %c16] : memref<64x36xbf16, #tpu.memory_space<vmem>>, vector<64x4xbf16>
    tpu.vector_store %arg10[%c0_49, %c16], %34 {strides = array<i32>} : memref<64x36xbf16, #tpu.memory_space<vmem>>, vector<64x4xbf16>,
    %c1_50 = arith.constant 1 : index
    %c2_51 = arith.constant 2 : index
    %c0_52 = arith.constant 0 : index
    %36 = vector.load %arg8[%c1_50, %c2_51, %c0_52] : memref<10x10x4xf32, #tpu.memory_space<vmem>>, vector<8x8x4xf32>
    %37 = vector.shape_cast %36 : vector<8x8x4xf32> to vector<64x4xf32>
    %38 = arith.truncf %37 : vector<64x4xf32> to vector<64x4xbf16>
    %c0_53 = arith.constant 0 : index
    %c20 = arith.constant 20 : index
    %39 = vector.load %arg10[%c0_53, %c20] : memref<64x36xbf16, #tpu.memory_space<vmem>>, vector<64x4xbf16>
    tpu.vector_store %arg10[%c0_53, %c20], %38 {strides = array<i32>} : memref<64x36xbf16, #tpu.memory_space<vmem>>, vector<64x4xbf16>,
    %c2_54 = arith.constant 2 : index
    %c0_55 = arith.constant 0 : index
    %c0_56 = arith.constant 0 : index
    %40 = vector.load %arg8[%c2_54, %c0_55, %c0_56] : memref<10x10x4xf32, #tpu.memory_space<vmem>>, vector<8x8x4xf32>
    %41 = vector.shape_cast %40 : vector<8x8x4xf32> to vector<64x4xf32>
    %42 = arith.truncf %41 : vector<64x4xf32> to vector<64x4xbf16>
    %c0_57 = arith.constant 0 : index
    %c24 = arith.constant 24 : index
    %43 = vector.load %arg10[%c0_57, %c24] : memref<64x36xbf16, #tpu.memory_space<vmem>>, vector<64x4xbf16>
    tpu.vector_store %arg10[%c0_57, %c24], %42 {strides = array<i32>} : memref<64x36xbf16, #tpu.memory_space<vmem>>, vector<64x4xbf16>,
    %c2_58 = arith.constant 2 : index
    %c1_59 = arith.constant 1 : index
    %c0_60 = arith.constant 0 : index
    %44 = vector.load %arg8[%c2_58, %c1_59, %c0_60] : memref<10x10x4xf32, #tpu.memory_space<vmem>>, vector<8x8x4xf32>
    %45 = vector.shape_cast %44 : vector<8x8x4xf32> to vector<64x4xf32>
    %46 = arith.truncf %45 : vector<64x4xf32> to vector<64x4xbf16>
    %c0_61 = arith.constant 0 : index
    %c28 = arith.constant 28 : index
    %47 = vector.load %arg10[%c0_61, %c28] : memref<64x36xbf16, #tpu.memory_space<vmem>>, vector<64x4xbf16>
    tpu.vector_store %arg10[%c0_61, %c28], %46 {strides = array<i32>} : memref<64x36xbf16, #tpu.memory_space<vmem>>, vector<64x4xbf16>,
    %c2_62 = arith.constant 2 : index
    %c2_63 = arith.constant 2 : index
    %c0_64 = arith.constant 0 : index
    %48 = vector.load %arg8[%c2_62, %c2_63, %c0_64] : memref<10x10x4xf32, #tpu.memory_space<vmem>>, vector<8x8x4xf32>
    %49 = vector.shape_cast %48 : vector<8x8x4xf32> to vector<64x4xf32>
    %50 = arith.truncf %49 : vector<64x4xf32> to vector<64x4xbf16>
    %c0_65 = arith.constant 0 : index
    %c32 = arith.constant 32 : index
    %51 = vector.load %arg10[%c0_65, %c32] : memref<64x36xbf16, #tpu.memory_space<vmem>>, vector<64x4xbf16>
    tpu.vector_store %arg10[%c0_65, %c32], %50 {strides = array<i32>} : memref<64x36xbf16, #tpu.memory_space<vmem>>, vector<64x4xbf16>,
    %c0_66 = arith.constant 0 : index
    %c0_67 = arith.constant 0 : index
    %52 = vector.load %arg10[%c0_66, %c0_67] : memref<64x36xbf16, #tpu.memory_space<vmem>>, vector<64x36xbf16>
    %c0_68 = arith.constant 0 : index
    %c0_69 = arith.constant 0 : index
    %53 = vector.load %arg2[%c0_68, %c0_69] : memref<36x8xbf16, #tpu.memory_space<vmem>>, vector<36x8xbf16>
    %cst_70 = arith.constant dense<0.000000e+00> : vector<64x8xf32>
    %54 = tpu.matmul %52, %53, %cst_70 {dimension_numbers = #tpu.dot_dimension_numbers<[1], [0], [0], [1], [0, 0, 1, 1], [], []>} : vector<64x36xbf16>, vector<36x8xbf16>, vector<64x8xf32> -> vector<64x8xf32>
    %c0_71 = arith.constant 0 : index
    %c0_72 = arith.constant 0 : index
    %55 = vector.load %arg3[%c0_71, %c0_72] : memref<1x8xf32, #tpu.memory_space<vmem>>, vector<1x8xf32>
    %56 = vector.broadcast %55 : vector<1x8xf32> to vector<64x8xf32>
    %57 = arith.addf %54, %56 : vector<64x8xf32>
    %cst_73 = arith.constant 0.000000e+00 : f32
    %58 = vector.broadcast %cst_73 : f32 to vector<64x8xf32>
    %59 = arith.maximumf %57, %58 : vector<64x8xf32>
    %cst_74 = arith.constant 0.000000e+00 : f32
    %60 = vector.broadcast %cst_74 : f32 to vector<1x10x8xf32>
    %c0_75 = arith.constant 0 : index
    %c0_76 = arith.constant 0 : index
    %c0_77 = arith.constant 0 : index
    %61 = vector.load %arg9[%c0_75, %c0_76, %c0_77] : memref<10x10x8xf32, #tpu.memory_space<vmem>>, vector<1x10x8xf32>
    tpu.vector_store %arg9[%c0_75, %c0_76, %c0_77], %60 {strides = array<i32>} : memref<10x10x8xf32, #tpu.memory_space<vmem>>, vector<1x10x8xf32>,
    %c9_78 = arith.constant 9 : index
    %c0_79 = arith.constant 0 : index
    %c0_80 = arith.constant 0 : index
    %62 = vector.load %arg9[%c9_78, %c0_79, %c0_80] : memref<10x10x8xf32, #tpu.memory_space<vmem>>, vector<1x10x8xf32>
    tpu.vector_store %arg9[%c9_78, %c0_79, %c0_80], %60 {strides = array<i32>} : memref<10x10x8xf32, #tpu.memory_space<vmem>>, vector<1x10x8xf32>,
    %cst_81 = arith.constant 0.000000e+00 : f32
    %63 = vector.broadcast %cst_81 : f32 to vector<10x1x8xf32>
    %c0_82 = arith.constant 0 : index
    %c0_83 = arith.constant 0 : index
    %c0_84 = arith.constant 0 : index
    %64 = vector.load %arg9[%c0_82, %c0_83, %c0_84] : memref<10x10x8xf32, #tpu.memory_space<vmem>>, vector<10x1x8xf32>
    tpu.vector_store %arg9[%c0_82, %c0_83, %c0_84], %63 {strides = array<i32>} : memref<10x10x8xf32, #tpu.memory_space<vmem>>, vector<10x1x8xf32>,
    %c0_85 = arith.constant 0 : index
    %c9_86 = arith.constant 9 : index
    %c0_87 = arith.constant 0 : index
    %65 = vector.load %arg9[%c0_85, %c9_86, %c0_87] : memref<10x10x8xf32, #tpu.memory_space<vmem>>, vector<10x1x8xf32>
    tpu.vector_store %arg9[%c0_85, %c9_86, %c0_87], %63 {strides = array<i32>} : memref<10x10x8xf32, #tpu.memory_space<vmem>>, vector<10x1x8xf32>,
    %66 = vector.shape_cast %59 : vector<64x8xf32> to vector<8x8x8xf32>
    %c1_88 = arith.constant 1 : index
    %c1_89 = arith.constant 1 : index
    %c0_90 = arith.constant 0 : index
    %67 = vector.load %arg9[%c1_88, %c1_89, %c0_90] : memref<10x10x8xf32, #tpu.memory_space<vmem>>, vector<8x8x8xf32>
    tpu.vector_store %arg9[%c1_88, %c1_89, %c0_90], %66 {strides = array<i32>} : memref<10x10x8xf32, #tpu.memory_space<vmem>>, vector<8x8x8xf32>,
    %c0_91 = arith.constant 0 : index
    %c0_92 = arith.constant 0 : index
    %c0_93 = arith.constant 0 : index
    %68 = vector.load %arg9[%c0_91, %c0_92, %c0_93] : memref<10x10x8xf32, #tpu.memory_space<vmem>>, vector<8x8x8xf32>
    %69 = vector.shape_cast %68 : vector<8x8x8xf32> to vector<64x8xf32>
    %70 = arith.truncf %69 : vector<64x8xf32> to vector<64x8xbf16>
    %c0_94 = arith.constant 0 : index
    %c0_95 = arith.constant 0 : index
    %71 = vector.load %arg11[%c0_94, %c0_95] : memref<64x72xbf16, #tpu.memory_space<vmem>>, vector<64x8xbf16>
    tpu.vector_store %arg11[%c0_94, %c0_95], %70 {strides = array<i32>} : memref<64x72xbf16, #tpu.memory_space<vmem>>, vector<64x8xbf16>,
    %c0_96 = arith.constant 0 : index
    %c1_97 = arith.constant 1 : index
    %c0_98 = arith.constant 0 : index
    %72 = vector.load %arg9[%c0_96, %c1_97, %c0_98] : memref<10x10x8xf32, #tpu.memory_space<vmem>>, vector<8x8x8xf32>
    %73 = vector.shape_cast %72 : vector<8x8x8xf32> to vector<64x8xf32>
    %74 = arith.truncf %73 : vector<64x8xf32> to vector<64x8xbf16>
    %c0_99 = arith.constant 0 : index
    %c8_100 = arith.constant 8 : index
    %75 = vector.load %arg11[%c0_99, %c8_100] : memref<64x72xbf16, #tpu.memory_space<vmem>>, vector<64x8xbf16>
    tpu.vector_store %arg11[%c0_99, %c8_100], %74 {strides = array<i32>} : memref<64x72xbf16, #tpu.memory_space<vmem>>, vector<64x8xbf16>,
    %c0_101 = arith.constant 0 : index
    %c2_102 = arith.constant 2 : index
    %c0_103 = arith.constant 0 : index
    %76 = vector.load %arg9[%c0_101, %c2_102, %c0_103] : memref<10x10x8xf32, #tpu.memory_space<vmem>>, vector<8x8x8xf32>
    %77 = vector.shape_cast %76 : vector<8x8x8xf32> to vector<64x8xf32>
    %78 = arith.truncf %77 : vector<64x8xf32> to vector<64x8xbf16>
    %c0_104 = arith.constant 0 : index
    %c16_105 = arith.constant 16 : index
    %79 = vector.load %arg11[%c0_104, %c16_105] : memref<64x72xbf16, #tpu.memory_space<vmem>>, vector<64x8xbf16>
    tpu.vector_store %arg11[%c0_104, %c16_105], %78 {strides = array<i32>} : memref<64x72xbf16, #tpu.memory_space<vmem>>, vector<64x8xbf16>,
    %c1_106 = arith.constant 1 : index
    %c0_107 = arith.constant 0 : index
    %c0_108 = arith.constant 0 : index
    %80 = vector.load %arg9[%c1_106, %c0_107, %c0_108] : memref<10x10x8xf32, #tpu.memory_space<vmem>>, vector<8x8x8xf32>
    %81 = vector.shape_cast %80 : vector<8x8x8xf32> to vector<64x8xf32>
    %82 = arith.truncf %81 : vector<64x8xf32> to vector<64x8xbf16>
    %c0_109 = arith.constant 0 : index
    %c24_110 = arith.constant 24 : index
    %83 = vector.load %arg11[%c0_109, %c24_110] : memref<64x72xbf16, #tpu.memory_space<vmem>>, vector<64x8xbf16>
    tpu.vector_store %arg11[%c0_109, %c24_110], %82 {strides = array<i32>} : memref<64x72xbf16, #tpu.memory_space<vmem>>, vector<64x8xbf16>,
    %c1_111 = arith.constant 1 : index
    %c1_112 = arith.constant 1 : index
    %c0_113 = arith.constant 0 : index
    %84 = vector.load %arg9[%c1_111, %c1_112, %c0_113] : memref<10x10x8xf32, #tpu.memory_space<vmem>>, vector<8x8x8xf32>
    %85 = vector.shape_cast %84 : vector<8x8x8xf32> to vector<64x8xf32>
    %86 = arith.truncf %85 : vector<64x8xf32> to vector<64x8xbf16>
    %c0_114 = arith.constant 0 : index
    %c32_115 = arith.constant 32 : index
    %87 = vector.load %arg11[%c0_114, %c32_115] : memref<64x72xbf16, #tpu.memory_space<vmem>>, vector<64x8xbf16>
    tpu.vector_store %arg11[%c0_114, %c32_115], %86 {strides = array<i32>} : memref<64x72xbf16, #tpu.memory_space<vmem>>, vector<64x8xbf16>,
    %c1_116 = arith.constant 1 : index
    %c2_117 = arith.constant 2 : index
    %c0_118 = arith.constant 0 : index
    %88 = vector.load %arg9[%c1_116, %c2_117, %c0_118] : memref<10x10x8xf32, #tpu.memory_space<vmem>>, vector<8x8x8xf32>
    %89 = vector.shape_cast %88 : vector<8x8x8xf32> to vector<64x8xf32>
    %90 = arith.truncf %89 : vector<64x8xf32> to vector<64x8xbf16>
    %c0_119 = arith.constant 0 : index
    %c40 = arith.constant 40 : index
    %91 = vector.load %arg11[%c0_119, %c40] : memref<64x72xbf16, #tpu.memory_space<vmem>>, vector<64x8xbf16>
    tpu.vector_store %arg11[%c0_119, %c40], %90 {strides = array<i32>} : memref<64x72xbf16, #tpu.memory_space<vmem>>, vector<64x8xbf16>,
    %c2_120 = arith.constant 2 : index
    %c0_121 = arith.constant 0 : index
    %c0_122 = arith.constant 0 : index
    %92 = vector.load %arg9[%c2_120, %c0_121, %c0_122] : memref<10x10x8xf32, #tpu.memory_space<vmem>>, vector<8x8x8xf32>
    %93 = vector.shape_cast %92 : vector<8x8x8xf32> to vector<64x8xf32>
    %94 = arith.truncf %93 : vector<64x8xf32> to vector<64x8xbf16>
    %c0_123 = arith.constant 0 : index
    %c48 = arith.constant 48 : index
    %95 = vector.load %arg11[%c0_123, %c48] : memref<64x72xbf16, #tpu.memory_space<vmem>>, vector<64x8xbf16>
    tpu.vector_store %arg11[%c0_123, %c48], %94 {strides = array<i32>} : memref<64x72xbf16, #tpu.memory_space<vmem>>, vector<64x8xbf16>,
    %c2_124 = arith.constant 2 : index
    %c1_125 = arith.constant 1 : index
    %c0_126 = arith.constant 0 : index
    %96 = vector.load %arg9[%c2_124, %c1_125, %c0_126] : memref<10x10x8xf32, #tpu.memory_space<vmem>>, vector<8x8x8xf32>
    %97 = vector.shape_cast %96 : vector<8x8x8xf32> to vector<64x8xf32>
    %98 = arith.truncf %97 : vector<64x8xf32> to vector<64x8xbf16>
    %c0_127 = arith.constant 0 : index
    %c56 = arith.constant 56 : index
    %99 = vector.load %arg11[%c0_127, %c56] : memref<64x72xbf16, #tpu.memory_space<vmem>>, vector<64x8xbf16>
    tpu.vector_store %arg11[%c0_127, %c56], %98 {strides = array<i32>} : memref<64x72xbf16, #tpu.memory_space<vmem>>, vector<64x8xbf16>,
    %c2_128 = arith.constant 2 : index
    %c2_129 = arith.constant 2 : index
    %c0_130 = arith.constant 0 : index
    %100 = vector.load %arg9[%c2_128, %c2_129, %c0_130] : memref<10x10x8xf32, #tpu.memory_space<vmem>>, vector<8x8x8xf32>
    %101 = vector.shape_cast %100 : vector<8x8x8xf32> to vector<64x8xf32>
    %102 = arith.truncf %101 : vector<64x8xf32> to vector<64x8xbf16>
    %c0_131 = arith.constant 0 : index
    %c64 = arith.constant 64 : index
    %103 = vector.load %arg11[%c0_131, %c64] : memref<64x72xbf16, #tpu.memory_space<vmem>>, vector<64x8xbf16>
    tpu.vector_store %arg11[%c0_131, %c64], %102 {strides = array<i32>} : memref<64x72xbf16, #tpu.memory_space<vmem>>, vector<64x8xbf16>,
    %c0_132 = arith.constant 0 : index
    %c0_133 = arith.constant 0 : index
    %104 = vector.load %arg11[%c0_132, %c0_133] : memref<64x72xbf16, #tpu.memory_space<vmem>>, vector<64x72xbf16>
    %c0_134 = arith.constant 0 : index
    %c0_135 = arith.constant 0 : index
    %105 = vector.load %arg4[%c0_134, %c0_135] : memref<72x8xbf16, #tpu.memory_space<vmem>>, vector<72x8xbf16>
    %cst_136 = arith.constant dense<0.000000e+00> : vector<64x8xf32>
    %106 = tpu.matmul %104, %105, %cst_136 {dimension_numbers = #tpu.dot_dimension_numbers<[1], [0], [0], [1], [0, 0, 1, 1], [], []>} : vector<64x72xbf16>, vector<72x8xbf16>, vector<64x8xf32> -> vector<64x8xf32>
    %c0_137 = arith.constant 0 : index
    %c0_138 = arith.constant 0 : index
    %107 = vector.load %arg5[%c0_137, %c0_138] : memref<1x8xf32, #tpu.memory_space<vmem>>, vector<1x8xf32>
    %108 = vector.broadcast %107 : vector<1x8xf32> to vector<64x8xf32>
    %109 = arith.addf %106, %108 : vector<64x8xf32>
    %cst_139 = arith.constant 0.000000e+00 : f32
    %110 = vector.broadcast %cst_139 : f32 to vector<64x8xf32>
    %111 = arith.maximumf %109, %110 : vector<64x8xf32>
    %c0_140 = arith.constant 0 : index
    %c0_141 = arith.constant 0 : index
    %c0_142 = arith.constant 0 : index
    %112 = vector.load %arg6[%c0_140, %c0_141, %c0_142] : memref<1x64x8xf32, #tpu.memory_space<vmem>>, vector<1x64x8xf32>
    %113 = vector.shape_cast %112 : vector<1x64x8xf32> to vector<64x8xf32>
    %114 = vector.shape_cast %111 : vector<64x8xf32> to vector<1x64x8xf32>
    tpu.vector_store %arg6[%c0_140, %c0_141, %c0_142], %114 {strides = array<i32>} : memref<1x64x8xf32, #tpu.memory_space<vmem>>, vector<1x64x8xf32>,
    return
  }
  func.func @transform_0(%arg0: i32) -> (i32, i32, i32, i32) {
    %c0_i32 = arith.constant 0 : i32
    %c0_i32_0 = arith.constant 0 : i32
    %c0_i32_1 = arith.constant 0 : i32
    %c0_i32_2 = arith.constant 0 : i32
    return %arg0, %c0_i32, %c0_i32_0, %c0_i32_1 : i32, i32, i32, i32
  }
  func.func @transform_1(%arg0: i32) -> (i32, i32) {
    %c0_i32 = arith.constant 0 : i32
    %c0_i32_0 = arith.constant 0 : i32
    %c0_i32_1 = arith.constant 0 : i32
    return %c0_i32, %c0_i32_0 : i32, i32
  }
  func.func @transform_2(%arg0: i32) -> (i32, i32) {
    %c0_i32 = arith.constant 0 : i32
    %c0_i32_0 = arith.constant 0 : i32
    %c0_i32_1 = arith.constant 0 : i32
    return %c0_i32, %c0_i32_0 : i32, i32
  }
  func.func @transform_3(%arg0: i32) -> (i32, i32) {
    %c0_i32 = arith.constant 0 : i32
    %c0_i32_0 = arith.constant 0 : i32
    %c0_i32_1 = arith.constant 0 : i32
    return %c0_i32, %c0_i32_0 : i32, i32
  }
  func.func @transform_4(%arg0: i32) -> (i32, i32) {
    %c0_i32 = arith.constant 0 : i32
    %c0_i32_0 = arith.constant 0 : i32
    %c0_i32_1 = arith.constant 0 : i32
    return %c0_i32, %c0_i32_0 : i32, i32
  }
  func.func @transform_5(%arg0: i32) -> (i32, i32, i32) {
    %c0_i32 = arith.constant 0 : i32
    %c0_i32_0 = arith.constant 0 : i32
    %c0_i32_1 = arith.constant 0 : i32
    return %arg0, %c0_i32, %c0_i32_0 : i32, i32, i32
  }
}

</mosaic_0001>

<bundles_post_ra>
// kernel: tpu_custom_call.1
= control target key start
LH: loop header
LB: loop body
LE: loop exit
PB: predicated region body
PF: predicated region fallthrough
CT: control target
= control target key end

     0   :  { %s1464_s18 = smov 0   ;;  %s1865_s0 = inlined_call_operand.vmem [shape: f32[2,16,16,4], index: 0, kind: input, shape index: {}]   ;;  %s1866_s1 = inlined_call_operand.vmem [shape: bf16[36,8], index: 1, kind: input, shape index: {}]   ;;  %s1867_s2 = inlined_call_operand.vmem [shape: f32[1,8], index: 2, kind: input, shape index: {}]   ;;  %s1868_s3 = inlined_call_operand.vmem [shape: bf16[72,8], index: 3, kind: input, shape index: {}]   ;;  %s1869_s4 = inlined_call_operand.vmem [shape: f32[1,8], index: 4, kind: input, shape index: {}]   ;;  %s1870_s5 = inlined_call_operand.vmem [shape: f32[2,64,8], index: 5, kind: output, shape index: {}]  }
   0x1 LB: > { %s1287_s19 = sadd.s32 4294967295, %s1419_s18   ;;  %p1291_p0 = scmp.ge.s32.totalorder %s1419_s18, 1  ;;  %s1419_s18 = sphi %s1464_s18, %s15_s18  }
   0x2   : > { %p187_p1 = scmp.lt.s32.totalorder %s1419_s18, 3 }
   0x4   : > { %p188_p2 = pnand %p1291_p0, %p187_p1 }
   0x5   : > { %p1474_p3 = scmp.lt.s32.totalorder (!%p188_p2), %s1287_s19, 1  ;;  %vm275_vm0 = vcmask (!%p188_p2), 31744   ;;  %vm332_vm1 = vcmask (!%p188_p2), 25600   ;;  %vm337_vm2 = vcmask (!%p188_p2), 24576   ;;  %v1421_v0 = vmov (!%p188_p2), 0.0   ;;  %s1422_s25 = smov (!%p188_p2), 4  }
   0x6   : > { %191 = sbr.rel (%p188_p2) target bundleno = 835 (0x343), region = 40  ;;  %331 = vst.msk [vmem:[#allocation3] sm:$0xff] (!%p188_p2), %vm275_vm0, %v1421_v0  ;;  %335 = vst.msk [vmem:[#allocation3 + $0x90] sm:$0xff] (!%p188_p2), %vm275_vm0, %v1421_v0  ;;  %s1423_s26 = smov (!%p188_p2), 8   ;;  %vm692_vm3 = vcmask (!%p188_p2), 1041408   ;;  %vm411_vm4 = vcmask (!%p188_p2), 64544  }
   0x7   : > { %333 = vst.msk [vmem:[#allocation3 + $0x8] sm:$0x3] (!%p188_p2), %vm332_vm1, %v1421_v0  ;;  %336 = vst.msk [vmem:[#allocation3 + $0x98] sm:$0x3] (!%p188_p2), %vm332_vm1, %v1421_v0  ;;  %s1424_s27 = smov (!%p188_p2), 12   ;;  %s1425_s28 = smov (!%p188_p2), 16  }
   0x8   : > { %339 = vst.msk [vmem:[#allocation3 + $0x10] sm:$0x1] (!%p188_p2), %vm337_vm2, %v1421_v0  ;;  %340 = vst.msk [vmem:[#allocation3 + $0x20] sm:$0x1] (!%p188_p2), %vm337_vm2, %v1421_v0  ;;  %s1426_s6 = smov (!%p188_p2), 20   ;;  %s1427_s9 = smov (!%p188_p2), 24  }
   0x9   : > { %341 = vst.msk [vmem:[#allocation3 + $0x30] sm:$0x1] (!%p188_p2), %vm337_vm2, %v1421_v0  ;;  %342 = vst.msk [vmem:[#allocation3 + $0x40] sm:$0x1] (!%p188_p2), %vm337_vm2, %v1421_v0  ;;  %s1428_s12 = smov (!%p188_p2), 28   ;;  %s1429_s13 = smov (!%p188_p2), 32  }
   0xa   : > { %343 = vst.msk [vmem:[#allocation3 + $0x50] sm:$0x1] (!%p188_p2), %vm337_vm2, %v1421_v0  ;;  %344 = vst.msk [vmem:[#allocation3 + $0x60] sm:$0x1] (!%p188_p2), %vm337_vm2, %v1421_v0  ;;  %vm444_vm5 = vcmask (!%p188_p2), 97344   ;;  %vm477_vm6 = vcmask (!%p188_p2), 130144  }
   0xb   : > { %345 = vst.msk [vmem:[#allocation3 + $0x70] sm:$0x1] (!%p188_p2), %vm337_vm2, %v1421_v0  ;;  %346 = vst.msk [vmem:[#allocation3 + $0x80] sm:$0x1] (!%p188_p2), %vm337_vm2, %v1421_v0  ;;  %vm510_vm7 = vcmask (!%p188_p2), 162944   ;;  %vm543_vm8 = vcmask (!%p188_p2), 195744  }
   0xc   : > { %349 = vst.msk [vmem:[#allocation3 + $0x19] sm:$0x1] (!%p188_p2), %vm337_vm2, %v1421_v0  ;;  %350 = vst.msk [vmem:[#allocation3 + $0x29] sm:$0x1] (!%p188_p2), %vm337_vm2, %v1421_v0  ;;  %vm577_vm9 = vcmask (!%p188_p2), 228544   ;;  %vm610_vm10 = vcmask (!%p188_p2), 261344  }
   0xd   : > { %351 = vst.msk [vmem:[#allocation3 + $0x39] sm:$0x1] %vm337_vm2, %v1421_v0  ;;  %352 = vst.msk [vmem:[#allocation3 + $0x49] sm:$0x1] %vm337_vm2, %v1421_v0  ;;  %s1873_s19 = smov (!%p1474_p3, %s1287_s19), 1  ;;  %vm643_vm11 = vcmask 294144  }
   0xe   : > { %353 = vst.msk [vmem:[#allocation3 + $0x59] sm:$0x1] %vm337_vm2, %v1421_v0  ;;  %354 = vst.msk [vmem:[#allocation3 + $0x69] sm:$0x1] %vm337_vm2, %v1421_v0  ;;  %s1332_s21 = sshll.u32 %s1873_s19, 8  ;;  %v383_v63 = vld [vmem:[#allocation3 + $0x1] sm:$0xff] }
   0xf   : > { %355 = vst.msk [vmem:[#allocation3 + $0x79] sm:$0x1] %vm337_vm2, %v1421_v0  ;;  %356 = vst.msk [vmem:[#allocation3 + $0x89] sm:$0x1] %vm337_vm2, %v1421_v0  ;;  %s1534_s24 = scalar_lea.vmem %s1865_s0, %s1332_s21  ;;  %vm679_vm12 = vcmask 293888   ;;  %vm769_vm13 = vcmask 64512  }
  0x10   : > { %338 = vst.msk [vmem:[#allocation3] sm:$0x1] %vm337_vm2, %v1421_v0  ;;  %348 = vst.msk [vmem:[#allocation3 + $0x9] sm:$0x1] %vm337_vm2, %v1421_v0  ;;  %v226_v1 = vld [vmem:[%s1534_s24] sm:$0xff]  ;;  %v227_v2 = vld [vmem:[%s1534_s24 + $0x8] sm:$0xff] }
  0x11   : > { %357 = vst.msk [vmem:[#allocation3 + $0x99] sm:$0x1] %vm337_vm2, %v1421_v0  ;;  %347 = vst.msk [vmem:[#allocation3 + $0x90] sm:$0x1] %vm337_vm2, %v1421_v0  ;;  %v1296_v3 = vld [vmem:[%s1534_s24 + $0x10] sm:$0xff]  ;;  %v1297_v4 = vld [vmem:[%s1534_s24 + $0x18] sm:$0xff] }
  0x12   : > { %v259_v5 = vmax.f32 %v226_v1, %v1296_v3  ;;  %v228_v6 = vld [vmem:[%s1534_s24 + $0x20] sm:$0xff]  ;;  %v229_v7 = vld [vmem:[%s1534_s24 + $0x28] sm:$0xff]  ;;  %v260_v8 = vmax.f32 %v227_v2, %v1297_v4  ;;  %v1298_v11 = vld [vmem:[%s1534_s24 + $0x30] sm:$0xff]  ;;  %770 = vst.msk [vmem:[#allocation4] sm:$0xff] %vm769_vm13, %v1421_v0  ;;  %vm771_vm14 = vcmask 58368   ;;  %vm776_vm15 = vcmask 57344  }
  0x13   : > { %v230_v9 = vld [vmem:[%s1534_s24 + $0x40] sm:$0xff]  ;;  %v231_v10 = vld [vmem:[%s1534_s24 + $0x48] sm:$0xff]  ;;  %v1299_v12 = vld [vmem:[%s1534_s24 + $0x38] sm:$0xff]  ;;  %v261_v15 = vmax.f32 %v228_v6, %v1298_v11  ;;  %774 = vst.msk [vmem:[#allocation4 + $0x90] sm:$0xff] %vm769_vm13, %v1421_v0  ;;  %s1430_s20 = smov 40   ;;  %s1432_s30 = smov 56  }
  0x14   : > { %276 = vst.msk [vmem:[#allocation2] sm:$0xff] %vm275_vm0, %v259_v5  ;;  %277 = vst.msk [vmem:[#allocation2 + $0x8] sm:$0xff] %vm275_vm0, %v260_v8  ;;  %v1300_v13 = vld [vmem:[%s1534_s24 + $0x50] sm:$0xff]  ;;  %v1301_v14 = vld [vmem:[%s1534_s24 + $0x58] sm:$0xff]  ;;  %v262_v16 = vmax.f32 %v229_v7, %v1299_v12  ;;  %vm850_vm1 = vcmask 130112   ;;  %vm883_vm2 = vcmask 195712  }
  0x15   : > { %v232_v17 = vld [vmem:[%s1534_s24 + $0x60] sm:$0xff]  ;;  %v263_v18 = vmax.f32 %v230_v9, %v1300_v13  ;;  %v264_v19 = vmax.f32 %v231_v10, %v1301_v14  ;;  %v233_v20 = vld [vmem:[%s1534_s24 + $0x68] sm:$0xff]  ;;  %v1302_v21 = vld [vmem:[%s1534_s24 + $0x70] sm:$0xff]  ;;  %278 = vst.msk [vmem:[#allocation2 + $0x10] sm:$0xff] %vm275_vm0, %v261_v15 }
  0x16   : > { %v1303_v22 = vld [vmem:[%s1534_s24 + $0x78] sm:$0xff]  ;;  %279 = vst.msk [vmem:[#allocation2 + $0x18] sm:$0xff] %vm275_vm0, %v262_v16  ;;  %v265_v23 = vmax.f32 %v232_v17, %v1302_v21  ;;  %v234_v25 = vld [vmem:[%s1534_s24 + $0x80] sm:$0xff]  ;;  %v235_v26 = vld [vmem:[%s1534_s24 + $0x88] sm:$0xff] }
  0x17   : > { %v266_v24 = vmax.f32 %v233_v20, %v1303_v22  ;;  %v1304_v27 = vld [vmem:[%s1534_s24 + $0x90] sm:$0xff]  ;;  %280 = vst.msk [vmem:[#allocation2 + $0x20] sm:$0xff] %vm275_vm0, %v263_v18  ;;  %281 = vst.msk [vmem:[#allocation2 + $0x28] sm:$0xff] %vm275_vm0, %v264_v19  ;;  %v1305_v28 = vld [vmem:[%s1534_s24 + $0x98] sm:$0xff] }
  0x18   : > { %v267_v29 = vmax.f32 %v234_v25, %v1304_v27  ;;  %v236_v30 = vld [vmem:[%s1534_s24 + $0xa0] sm:$0xff]  ;;  %v237_v31 = vld [vmem:[%s1534_s24 + $0xa8] sm:$0xff]  ;;  %282 = vst.msk [vmem:[#allocation2 + $0x30] sm:$0xff] %vm275_vm0, %v265_v23  ;;  %v268_v32 = vmax.f32 %v235_v26, %v1305_v28  ;;  %v1306_v35 = vld [vmem:[%s1534_s24 + $0xb0] sm:$0xff] }
  0x19   : > { %283 = vst.msk [vmem:[#allocation2 + $0x38] sm:$0xff] %vm275_vm0, %v266_v24  ;;  %v238_v33 = vld [vmem:[%s1534_s24 + $0xc0] sm:$0xff]  ;;  %v239_v34 = vld [vmem:[%s1534_s24 + $0xc8] sm:$0xff]  ;;  %v1307_v36 = vld [vmem:[%s1534_s24 + $0xb8] sm:$0xff]  ;;  %v269_v39 = vmax.f32 %v236_v30, %v1306_v35 }
  0x1a   : > { %284 = vst.msk [vmem:[#allocation2 + $0x40] sm:$0xff] %vm275_vm0, %v267_v29  ;;  %v1308_v37 = vld [vmem:[%s1534_s24 + $0xd0] sm:$0xff]  ;;  %v1309_v38 = vld [vmem:[%s1534_s24 + $0xd8] sm:$0xff]  ;;  %285 = vst.msk [vmem:[#allocation2 + $0x48] sm:$0xff] %vm275_vm0, %v268_v32  ;;  %v270_v40 = vmax.f32 %v237_v31, %v1307_v36 }
  0x1b   : > { %v271_v41 = vmax.f32 %v238_v33, %v1308_v37  ;;  %v272_v42 = vmax.f32 %v239_v34, %v1309_v38  ;;  %v240_v43 = vld [vmem:[%s1534_s24 + $0xe0] sm:$0xff]  ;;  %v241_v44 = vld [vmem:[%s1534_s24 + $0xe8] sm:$0xff]  ;;  %v1310_v45 = vld [vmem:[%s1534_s24 + $0xf0] sm:$0xff]  ;;  %286 = vst.msk [vmem:[#allocation2 + $0x50] sm:$0xff] %vm275_vm0, %v269_v39 }
  0x1c   : > { %v292_v46 = vld [vmem:[#allocation2] ss:$2 sm:$0xff]  ;;  %v308_v47 = vld [vmem:[#allocation2 + $0x1] ss:$2 sm:$0xff]  ;;  %v1311_v48 = vld [vmem:[%s1534_s24 + $0xf8] sm:$0xff]  ;;  %v273_v49 = vmax.f32 %v240_v43, %v1310_v45  ;;  %287 = vst.msk [vmem:[#allocation2 + $0x58] sm:$0xff] %vm275_vm0, %v270_v40 }
  0x1d   : > { %v323_v50 = vmax.f32 %v292_v46, %v308_v47  ;;  %288 = vst.msk [vmem:[#allocation2 + $0x60] sm:$0xff] %vm275_vm0, %v271_v41  ;;  %289 = vst.msk [vmem:[#allocation2 + $0x68] sm:$0xff] %vm275_vm0, %v272_v42  ;;  %v274_v51 = vmax.f32 %v241_v44, %v1311_v48  ;;  %v294_v52 = vld [vmem:[#allocation2 + $0x10] ss:$2 sm:$0xff]  ;;  %v310_v53 = vld [vmem:[#allocation2 + $0x11] ss:$2 sm:$0xff] }
  0x1e   : > { %290 = vst.msk [vmem:[#allocation2 + $0x70] sm:$0xff] %vm275_vm0, %v273_v49  ;;  %v296_v54 = vld [vmem:[#allocation2 + $0x20] ss:$2 sm:$0xff]  ;;  %v312_v55 = vld [vmem:[#allocation2 + $0x21] ss:$2 sm:$0xff]  ;;  %v324_v56 = vmax.f32 %v294_v52, %v310_v53 }
  0x1f   : > { %359 = vst.msk [vmem:[#allocation3 + $0x11] sm:$0xff] %vm275_vm0, %v323_v50  ;;  %291 = vst.msk [vmem:[#allocation2 + $0x78] sm:$0xff] %vm275_vm0, %v274_v51  ;;  %v325_v57 = vmax.f32 %v296_v54, %v312_v55  ;;  %v416_v1 = vld [vmem:[#allocation3 + $0x2] sm:$0xff]  ;;  %v1407_v46 = vld [vmem:[%s1866_s1 + $0x10] ss:$0 sps:$4 sm:$0x33]  }
  0x20   : > { %v298_v58 = vld [vmem:[#allocation2 + $0x30] ss:$2 sm:$0xff]  ;;  %v314_v59 = vld [vmem:[#allocation2 + $0x31] ss:$2 sm:$0xff]  ;;  %360 = vst.msk [vmem:[#allocation3 + $0x21] sm:$0xff] %vm275_vm0, %v324_v56  ;;  %v367_v3 = vld [vmem:[#allocation3] sm:$0xff] }
  0x21   : > { %v326_v60 = vmax.f32 %v298_v58, %v314_v59  ;;  %361 = vst.msk [vmem:[#allocation3 + $0x31] sm:$0xff] %vm275_vm0, %v325_v57  ;;  %v300_v61 = vld [vmem:[#allocation2 + $0x40] ss:$2 sm:$0xff]  ;;  %v316_v62 = vld [vmem:[#allocation2 + $0x41] ss:$2 sm:$0xff]  ;;  %v694_v47 = vsel %vm692_vm3, %v1407_v46, 0 }
  0x22   : > { %v327_v2 = vmax.f32 %v300_v61, %v316_v62  ;;  %v1405_v42 = vld [vmem:[%s1866_s1] sm:$0xff]   ;;  %v1406_v44 = vld [vmem:[%s1866_s1 + $0x8] sm:$0xff]   ;;  %772 = vst.msk [vmem:[#allocation4 + $0x8] sm:$0x3] %vm771_vm14, %v1421_v0  ;;  %775 = vst.msk [vmem:[#allocation4 + $0x98] sm:$0x3] %vm771_vm14, %v1421_v0 }
  0x23   : > { %362 = vst.msk [vmem:[#allocation3 + $0x41] sm:$0xff] %vm275_vm0, %v326_v60  ;;  %v302_v4 = vld [vmem:[#allocation2 + $0x50] ss:$2 sm:$0xff]  ;;  %v318_v6 = vld [vmem:[#allocation2 + $0x51] ss:$2 sm:$0xff]  ;;  %1350 = vmatprep.subr.bf16.mxu0 %v1405_v42 }
  0x24   : > { %v304_v5 = vld [vmem:[#allocation2 + $0x60] ss:$2 sm:$0xff]  ;;  %363 = vst.msk [vmem:[#allocation3 + $0x51] sm:$0xff] %vm275_vm0, %v327_v2  ;;  %v320_v7 = vld [vmem:[#allocation2 + $0x61] ss:$2 sm:$0xff]  ;;  %v328_v8 = vmax.f32 %v302_v4, %v318_v6  ;;  %1351 = vmatpush3.bf16.msra.mxu0 %v1405_v42  ;;  %v556_v2 = vld [vmem:[#allocation3 + $0x90] sm:$0xff] }
  0x25   : > { %v329_v12 = vmax.f32 %v304_v5, %v320_v7  ;;  %1352 = vmatprep.subr.bf16.mxu0 %v1406_v44  ;;  %v589_v4 = vld [vmem:[#allocation3 + $0x91] sm:$0xff]  ;;  %780 = vst.msk [vmem:[#allocation4 + $0x30] sm:$0x1] %vm776_vm15, %v1421_v0  ;;  %781 = vst.msk [vmem:[#allocation4 + $0x40] sm:$0x1] %vm776_vm15, %v1421_v0 }
  0x26   : > { %v384_v9 = vld [vmem:[#allocation3 + $0x11] sm:$0xff]  ;;  %364 = vst.msk [vmem:[#allocation3 + $0x61] sm:$0xff] %vm275_vm0, %v328_v8 }
  0x27   : > { %v417_v10 = vld [vmem:[#allocation3 + $0x12] sm:$0xff]  ;;  %v391_v13 = vpack.c.bf16 %v384_v9, %v383_v63  ;;  %v385_v18 = vld [vmem:[#allocation3 + $0x21] sm:$0xff]  ;;  %365 = vst.msk [vmem:[#allocation3 + $0x71] sm:$0xff] %vm275_vm0, %v329_v12 }
  0x28   : > { %v449_v11 = vld [vmem:[#allocation3 + $0x10] sm:$0xff]  ;;  %v424_v14 = vpack.c.bf16 %v417_v10, %v416_v1  ;;  %v418_v19 = vld [vmem:[#allocation3 + $0x22] sm:$0xff]  ;;  %v490_v37 = vpack.c.bf16 %v385_v18, %v384_v9  ;;  %1353 = vmatpush3.bf16.msra.mxu0 %v1406_v44  ;;  %777 = vst.msk [vmem:[#allocation4] sm:$0x1] %vm776_vm15, %v1421_v0  ;;  %778 = vst.msk [vmem:[#allocation4 + $0x10] sm:$0x1] %vm776_vm15, %v1421_v0 }
  0x29   : > { %v306_v15 = vld [vmem:[#allocation2 + $0x70] ss:$2 sm:$0xff]  ;;  %v322_v16 = vld [vmem:[#allocation2 + $0x71] ss:$2 sm:$0xff]  ;;  %v375_v17 = vpack.c.bf16 %v449_v11, %v367_v3  ;;  %v450_v20 = vld [vmem:[#allocation3 + $0x20] sm:$0xff]  ;;  %399 = vrot.lane.b32.xlu0 %v391_v13, %s1422_s25  ;;  %v523_v40 = vpack.c.bf16 %v418_v19, %v417_v10  ;;  %1382 = vmatprep.subr.msk.bf16.mxu0 %vm692_vm3, %v1407_v46  ;;  %vm916_vm3 = vcmask 261312  }
  0x2a   : > { %v330_v21 = vmax.f32 %v306_v15, %v322_v16  ;;  %432 = vrot.lane.b32.xlu1 %v424_v14, %s1423_s26  ;;  %v386_v22 = vld [vmem:[#allocation3 + $0x31] sm:$0xff]  ;;  %v452_v27 = vld [vmem:[#allocation3 + $0x40] sm:$0xff]  ;;  %v457_v30 = vpack.c.bf16 %v450_v20, %v449_v11  ;;  %779 = vst.msk [vmem:[#allocation4 + $0x20] sm:$0x1] %vm776_vm15, %v1421_v0  ;;  %782 = vst.msk [vmem:[#allocation4 + $0x50] sm:$0x1] %vm776_vm15, %v1421_v0 }
  0x2b   : > { %v419_v23 = vld [vmem:[#allocation3 + $0x32] sm:$0xff]  ;;  %379 = vst.msk [vmem:[#allocation5] sm:$0xff] %vm275_vm0, %v375_v17  ;;  %v392_v25 = vpack.c.bf16 %v386_v22, %v385_v18  ;;  %v485_v33 = vld [vmem:[#allocation3 + $0x41] sm:$0xff]  ;;  %v1730_v44 = vld [vmem:[%s1867_s2] ss:$0 sm:$0xff] }
  0x2c   : > { %v451_v24 = vld [vmem:[#allocation3 + $0x30] sm:$0xff]  ;;  %v425_v26 = vpack.c.bf16 %v419_v23, %v418_v19  ;;  %366 = vst.msk [vmem:[#allocation3 + $0x81] sm:$0xff] %vm275_vm0, %v330_v21  ;;  %v491_v38 = vpack.c.bf16 %v485_v33, %v386_v22  ;;  %v518_v39 = vld [vmem:[#allocation3 + $0x42] sm:$0xff]  ;;  %1355 = vmatpush3.bf16.msra.mxu0 %v694_v47 }
  0x2d   : > { %v557_v28 = vpack.c.bf16 %v451_v24, %v450_v20  ;;  %v1595_v29 = vld [vmem:[#allocation3 + $0x50] sm:$0xff]  ;;  %401 = vrot.lane.b32.xlu0 %v392_v25, %s1422_s25  ;;  %v458_v31 = vpack.c.bf16 %v452_v27, %v451_v24  ;;  %v454_v34 = vld [vmem:[#allocation3 + $0x60] sm:$0xff]  ;;  %v524_v41 = vpack.c.bf16 %v518_v39, %v419_v23  ;;  %783 = vst.msk [vmem:[#allocation4 + $0x60] sm:$0x1] %vm776_vm15, %v1421_v0  ;;  %784 = vst.msk [vmem:[#allocation4 + $0x70] sm:$0x1] %vm776_vm15, %v1421_v0 }
  0x2e   : > { %434 = vrot.lane.b32.xlu1 %v425_v26, %s1423_s26  ;;  %v558_v32 = vpack.c.bf16 %v1595_v29, %v452_v27  ;;  %v455_v35 = vld [vmem:[#allocation3 + $0x70] sm:$0xff]  ;;  %v389_v49 = vld [vmem:[#allocation3 + $0x61] sm:$0xff]  ;;  %v459_v57 = vpack.c.bf16 %v454_v34, %v1595_v29  ;;  %785 = vst.msk [vmem:[#allocation4 + $0x80] sm:$0x1] %vm776_vm15, %v1421_v0  ;;  %786 = vst.msk [vmem:[#allocation4 + $0x90] sm:$0x1] %vm776_vm15, %v1421_v0 }
  0x2f   : > { %380 = vst.msk [vmem:[#allocation5 + $0x8] sm:$0xff] %vm275_vm0, %v557_v28  ;;  %v1602_v36 = vpack.c.bf16 %v455_v35, %v454_v34  ;;  %v585_v43 = vld [vmem:[#allocation3 + $0x51] sm:$0xff]  ;;  %v422_v53 = vld [vmem:[#allocation3 + $0x62] sm:$0xff] }
  0x30   : > { %381 = vst.msk [vmem:[#allocation5 + $0x10] sm:$0xff] %vm275_vm0, %v558_v32  ;;  %v591_v45 = vpack.c.bf16 %v585_v43, %v485_v33  ;;  %v618_v48 = vld [vmem:[#allocation3 + $0x52] sm:$0xff]  ;;  %v492_v60 = vpack.c.bf16 %v389_v49, %v585_v43 }
  0x31   : > { %465 = vrot.lane.b32.xlu0 %v457_v30, %s1424_s27  ;;  %382 = vst.msk [vmem:[#allocation5 + $0x18] sm:$0xff] %vm275_vm0, %v1602_v36  ;;  %v390_v50 = vld [vmem:[#allocation3 + $0x71] sm:$0xff]  ;;  %v624_v51 = vpack.c.bf16 %v618_v48, %v518_v39  ;;  %v525_v63 = vpack.c.bf16 %v422_v53, %v618_v48  ;;  %vm1147_vm0 = vcmask 1043456  }
  0x32   : > { %467 = vrot.lane.b32.xlu1 %v458_v31, %s1424_s27  ;;  %v394_v52 = vpack.c.bf16 %v390_v50, %v389_v49  ;;  %v423_v54 = vld [vmem:[#allocation3 + $0x72] sm:$0xff]  ;;  %788 = vst.msk [vmem:[#allocation4 + $0x19] sm:$0x1] %vm776_vm15, %v1421_v0  ;;  %789 = vst.msk [vmem:[#allocation4 + $0x29] sm:$0x1] %vm776_vm15, %v1421_v0 }
  0x33   : > { %v427_v55 = vpack.c.bf16 %v423_v54, %v422_v53  ;;  %v456_v56 = vld [vmem:[#allocation3 + $0x80] sm:$0xff]  ;;  %v622_v6 = vld [vmem:[#allocation3 + $0x92] sm:$0xff]  ;;  %790 = vst.msk [vmem:[#allocation4 + $0x39] sm:$0x1] %vm776_vm15, %v1421_v0  ;;  %791 = vst.msk [vmem:[#allocation4 + $0x49] sm:$0x1] %vm776_vm15, %v1421_v0 }
  0x34   : > { %v460_v58 = vpack.c.bf16 %v456_v56, %v455_v35  ;;  %v489_v59 = vld [vmem:[#allocation3 + $0x81] sm:$0xff]  ;;  %v560_v3 = vpack.c.bf16 %v556_v2, %v456_v56  ;;  %792 = vst.msk [vmem:[#allocation4 + $0x59] sm:$0x1] %vm776_vm15, %v1421_v0  ;;  %793 = vst.msk [vmem:[#allocation4 + $0x69] sm:$0x1] %vm776_vm15, %v1421_v0 }
  0x35   : > { %498 = vrot.lane.b32.xlu0 %v490_v37, %s1425_s28  ;;  %v493_v61 = vpack.c.bf16 %v489_v59, %v390_v50  ;;  %v522_v62 = vld [vmem:[#allocation3 + $0x82] sm:$0xff]  ;;  %v593_v5 = vpack.c.bf16 %v589_v4, %v489_v59  ;;  %794 = vst.msk [vmem:[#allocation4 + $0x79] sm:$0x1] %vm776_vm15, %v1421_v0  ;;  %795 = vst.msk [vmem:[#allocation4 + $0x89] sm:$0x1] %vm776_vm15, %v1421_v0 }
  0x36   : > { %500 = vrot.lane.b32.xlu1 %v491_v38, %s1425_s28  ;;  %v526_v1 = vpack.c.bf16 %v522_v62, %v423_v54  ;;  %v626_v7 = vpack.c.bf16 %v622_v6, %v522_v62  ;;  %787 = vst.msk [vmem:[#allocation4 + $0x9] sm:$0x1] %vm776_vm15, %v1421_v0  ;;  %796 = vst.msk [vmem:[#allocation4 + $0x99] sm:$0x1] %vm776_vm15, %v1421_v0  ;;  %v822_v56 = vld [vmem:[#allocation4 + $0x1] sm:$0xff] }
  0x39   : > { %531 = vrot.lane.b32.xlu0 %v523_v40, %s1426_s6 }
  0x3a   : > { %533 = vrot.lane.b32.xlu1 %v524_v41, %s1426_s6 }
  0x3d   : > { %565 = vrot.lane.b32.xlu0 %v557_v28, %s1427_s9  ;;  %v855_v2 = vld [vmem:[#allocation4 + $0x2] sm:$0xff] }
  0x3e   : > { %567 = vrot.lane.b32.xlu1 %v558_v32, %s1427_s9 }
  0x41   : > { %598 = vrot.lane.b32.xlu0 %v392_v25, %s1428_s12 }
  0x42   : > { %600 = vrot.lane.b32.xlu1 %v591_v45, %s1428_s12 }
  0x45   : > { %631 = vrot.lane.b32.xlu0 %v425_v26, %s1429_s13 }
  0x46   : > { %403 = vrot.lane.b32.xlu1 %v591_v45, %s1422_s25 }
  0x49   : > { %633 = vrot.lane.b32.xlu0 %v624_v51, %s1429_s13 }
  0x4a   : > { %405 = vrot.lane.b32.xlu1 %v394_v52, %s1422_s25  ;;  %s1431_s25 = smov 48  }
  0x4d   : > { %436 = vrot.lane.b32.xlu0 %v624_v51, %s1423_s26 }
  0x4e   : > { %438 = vrot.lane.b32.xlu1 %v427_v55, %s1423_s26 }
  0x51   : > { %469 = vrot.lane.b32.xlu0 %v459_v57, %s1424_s27  ;;  %v806_v57 = vld [vmem:[#allocation4] sm:$0xff] }
  0x52   : > { %471 = vrot.lane.b32.xlu1 %v460_v58, %s1424_s27 }
  0x55   : > { %502 = vrot.lane.b32.xlu0 %v492_v60, %s1425_s28 }
  0x56   : > { %504 = vrot.lane.b32.xlu1 %v493_v61, %s1425_s28 }
  0x59   : > { %535 = vrot.lane.b32.xlu0 %v525_v63, %s1426_s6 }
  0x5a   : > { %537 = vrot.lane.b32.xlu1 %v526_v1, %s1426_s6  ;;  %s1433_s6 = smov 64  }
  0x5d   : > { %569 = vrot.lane.b32.xlu0 %v1602_v36, %s1427_s9 }
  0x5e   : > { %571 = vrot.lane.b32.xlu1 %v560_v3, %s1427_s9 }
  0x61   : > { %602 = vrot.lane.b32.xlu0 %v394_v52, %s1428_s12 }
  0x62   : > { %604 = vrot.lane.b32.xlu1 %v593_v5, %s1428_s12 }
  0x65   : > { %635 = vrot.lane.b32.xlu0 %v427_v55, %s1429_s13 }
  0x66   : > { %637 = vrot.lane.b32.xlu1 %v626_v7, %s1429_s13 }
  0x9b   : > { %v400_v8 = vpop.permute.xlu0 %399 }
  0x9c   : > { %v433_v9 = vpop.permute.xlu1 %432  ;;  %412 = vst.msk [vmem:[#allocation5] sm:$0xff] %vm411_vm4, %v400_v8 }
  0x9d   : > { %445 = vst.msk [vmem:[#allocation5] sm:$0xff] %vm444_vm5, %v433_v9 }
  0x9f   : > { %v402_v10 = vpop.permute.xlu0 %401 }
  0xa0   : > { %v435_v11 = vpop.permute.xlu1 %434  ;;  %413 = vst.msk [vmem:[#allocation5 + $0x8] sm:$0xff] %vm411_vm4, %v402_v10 }
  0xa1   : > { %446 = vst.msk [vmem:[#allocation5 + $0x8] sm:$0xff] %vm444_vm5, %v435_v11 }
  0xa3   : > { %v466_v12 = vpop.permute.xlu0 %465 }
  0xa4   : > { %v468_v13 = vpop.permute.xlu1 %467  ;;  %478 = vst.msk [vmem:[#allocation5] sm:$0xff] %vm477_vm6, %v466_v12 }
  0xa5   : > { %479 = vst.msk [vmem:[#allocation5 + $0x8] sm:$0xff] %vm477_vm6, %v468_v13 }
  0xa7   : > { %v499_v14 = vpop.permute.xlu0 %498 }
  0xa8   : > { %v501_v15 = vpop.permute.xlu1 %500  ;;  %511 = vst.msk [vmem:[#allocation5] sm:$0xff] %vm510_vm7, %v499_v14 }
  0xa9   : > { %512 = vst.msk [vmem:[#allocation5 + $0x8] sm:$0xff] %vm510_vm7, %v501_v15  ;;  %v1408_v15 = vld [vmem:[%s1868_s3] sm:$0xff]  }
  0xaa   : > { %1364 = vmatprep.subr.bf16.mxu1 %v1408_v15 }
  0xab   : > { %v532_v16 = vpop.permute.xlu0 %531  ;;  %1365 = vmatpush3.bf16.msra.mxu1 %v1408_v15 }
  0xac   : > { %v534_v17 = vpop.permute.xlu1 %533  ;;  %544 = vst.msk [vmem:[#allocation5] sm:$0xff] %vm543_vm8, %v532_v16 }
  0xad   : > { %545 = vst.msk [vmem:[#allocation5 + $0x8] sm:$0xff] %vm543_vm8, %v534_v17 }
  0xaf   : > { %v566_v18 = vpop.permute.xlu0 %565 }
  0xb0   : > { %v568_v19 = vpop.permute.xlu1 %567  ;;  %578 = vst.msk [vmem:[#allocation5] sm:$0xff] %vm577_vm9, %v566_v18 }
  0xb1   : > { %579 = vst.msk [vmem:[#allocation5 + $0x8] sm:$0xff] %vm577_vm9, %v568_v19  ;;  %v1409_v19 = vld [vmem:[%s1868_s3 + $0x8] sm:$0xff]  }
  0xb2   : > { %1366 = vmatprep.subr.bf16.mxu1 %v1409_v19 }
  0xb3   : > { %v599_v20 = vpop.permute.xlu0 %598  ;;  %1367 = vmatpush3.bf16.msra.mxu1 %v1409_v19 }
  0xb4   : > { %v601_v21 = vpop.permute.xlu1 %600  ;;  %611 = vst.msk [vmem:[#allocation5] sm:$0xff] %vm610_vm10, %v599_v20 }
  0xb5   : > { %612 = vst.msk [vmem:[#allocation5 + $0x8] sm:$0xff] %vm610_vm10, %v601_v21 }
  0xb7   : > { %v632_v22 = vpop.permute.xlu0 %631 }
  0xb8   : > { %v404_v23 = vpop.permute.xlu1 %403  ;;  %644 = vst.msk [vmem:[#allocation5] sm:$0xff] %vm643_vm11, %v632_v22 }
  0xb9   : > { %414 = vst.msk [vmem:[#allocation5 + $0x10] sm:$0xff] %vm411_vm4, %v404_v23 }
  0xbb   : > { %v634_v24 = vpop.permute.xlu0 %633 }
  0xbc   : > { %v406_v25 = vpop.permute.xlu1 %405  ;;  %645 = vst.msk [vmem:[#allocation5 + $0x8] sm:$0xff] %vm643_vm11, %v634_v24 }
  0xbd   : > { %415 = vst.msk [vmem:[#allocation5 + $0x18] sm:$0xff] %vm411_vm4, %v406_v25  ;;  %vm949_vm4 = vcmask 326912  }
  0xbf   : > { %v437_v26 = vpop.permute.xlu0 %436  ;;  %v648_v28 = vld [vmem:[#allocation5] sm:$0xff] }
  0xc0   : > { %v439_v27 = vpop.permute.xlu1 %438  ;;  %447 = vst.msk [vmem:[#allocation5 + $0x10] sm:$0xff] %vm444_vm5, %v437_v26  ;;  %1356 = vmatprep.mubr.msk.bf16.mxu0 %vm679_vm12, %v648_v28 }
  0xc1   : > { %448 = vst.msk [vmem:[#allocation5 + $0x18] sm:$0xff] %vm444_vm5, %v439_v27  ;;  %vm982_vm5 = vcmask 392512  }
  0xc3   : > { %v470_v29 = vpop.permute.xlu0 %469  ;;  %v649_v31 = vld [vmem:[#allocation5 + $0x8] sm:$0xff] }
  0xc4   : > { %v472_v30 = vpop.permute.xlu1 %471  ;;  %480 = vst.msk [vmem:[#allocation5 + $0x10] sm:$0xff] %vm477_vm6, %v470_v29  ;;  %1357 = vmatmul.mubr.msk.bf16.vlgmr.msra.gmra.mrb[0].mxu0 %vm679_vm12, %v649_v31 }
  0xc5   : > { %481 = vst.msk [vmem:[#allocation5 + $0x18] sm:$0xff] %vm477_vm6, %v472_v30  ;;  %v1410_v30 = vld [vmem:[%s1868_s3 + $0x10] sm:$0xff]   ;;  %vm1016_vm6 = vcmask 458112  }
  0xc6   : > { %1368 = vmatprep.subr.bf16.mxu1 %v1410_v30 }
  0xc7   : > { %v503_v32 = vpop.permute.xlu0 %502  ;;  %1369 = vmatpush3.bf16.msra.mxu1 %v1410_v30 }
  0xc8   : > { %v505_v33 = vpop.permute.xlu1 %504  ;;  %513 = vst.msk [vmem:[#allocation5 + $0x10] sm:$0xff] %vm510_vm7, %v503_v32 }
  0xc9   : > { %514 = vst.msk [vmem:[#allocation5 + $0x18] sm:$0xff] %vm510_vm7, %v505_v33  ;;  %vm1049_vm7 = vcmask 523712  }
  0xcb   : > { %v536_v34 = vpop.permute.xlu0 %535 }
  0xcc   : > { %v538_v35 = vpop.permute.xlu1 %537  ;;  %546 = vst.msk [vmem:[#allocation5 + $0x10] sm:$0xff] %vm543_vm8, %v536_v34 }
  0xcd   : > { %547 = vst.msk [vmem:[#allocation5 + $0x18] sm:$0xff] %vm543_vm8, %v538_v35  ;;  %v1411_v35 = vld [vmem:[%s1868_s3 + $0x18] sm:$0xff]   ;;  %vm1082_vm8 = vcmask 589312  }
  0xce   : > { %1370 = vmatprep.subr.bf16.mxu1 %v1411_v35 }
  0xcf   : > { %v570_v36 = vpop.permute.xlu0 %569  ;;  %1371 = vmatpush3.bf16.msra.mxu1 %v1411_v35 }
  0xd0   : > { %v572_v37 = vpop.permute.xlu1 %571  ;;  %580 = vst.msk [vmem:[#allocation5 + $0x10] sm:$0xff] %vm577_vm9, %v570_v36 }
  0xd1   : > { %581 = vst.msk [vmem:[#allocation5 + $0x18] sm:$0xff] %vm577_vm9, %v572_v37  ;;  %vm1134_vm9 = vcmask 588800  }
  0xd3   : > { %v603_v38 = vpop.permute.xlu0 %602 }
  0xd4   : > { %v605_v39 = vpop.permute.xlu1 %604  ;;  %613 = vst.msk [vmem:[#allocation5 + $0x10] sm:$0xff] %vm610_vm10, %v603_v38 }
  0xd5   : > { %614 = vst.msk [vmem:[#allocation5 + $0x18] sm:$0xff] %vm610_vm10, %v605_v39 }
  0xd7   : > { %v636_v40 = vpop.permute.xlu0 %635 }
  0xd8   : > { %v638_v41 = vpop.permute.xlu1 %637  ;;  %646 = vst.msk [vmem:[#allocation5 + $0x10] sm:$0xff] %vm643_vm11, %v636_v40 }
  0xd9   : > { %647 = vst.msk [vmem:[#allocation5 + $0x18] sm:$0xff] %vm643_vm11, %v638_v41 }
  0xdf   : > { %v650_v42 = vld [vmem:[#allocation5 + $0x10] sm:$0xff] }
  0xe0   : > { %v651_v43 = vld [vmem:[#allocation5 + $0x18] sm:$0xff]  ;;  %1360 = vmatprep.mubr.msk.bf16.mxu0 %vm679_vm12, %v650_v42 }
  0xe1   : > { %1361 = vmatmul.mubr.msk.bf16.gmra.mrb[4].mxu0 %vm679_vm12, %v651_v43  ;;  %v1412_v43 = vld [vmem:[%s1868_s3 + $0x20] ss:$0 sps:$4 sm:$0xff]  }
  0xe2   : > { %1383 = vmatprep.subr.msk.bf16.mxu1 %vm1147_vm0, %v1412_v43 }
 0x197   : > { %v1358_v45 = vpop.f32.mrb[0].mxu0 }
 0x198   : > { %v739_v46 = vadd.f32 %v1358_v45, %v1730_v44  ;;  %v730_v47 = vpop.f32.mrb[1].mxu0 }
 0x199   : > { %v731_v48 = vadd.f32 %v1730_v44, %v730_v47  ;;  %v1359_v49 = vpop.f32.mrb[2].mxu0 }
 0x19a   : > { %v763_v50 = vmax.f32 %v739_v46, 0.0  ;;  %v742_v51 = vadd.f32 %v1359_v49, %v1730_v44  ;;  %v733_v52 = vpop.f32.mrb[3].mxu0  ;;  %v1149_v46 = vsel %vm1147_vm0, %v1412_v43, 0 }
 0x19b   : > { %v761_v53 = vmax.f32 %v731_v48, 0.0  ;;  %v734_v54 = vadd.f32 %v1730_v44, %v733_v52  ;;  %1373 = vmatpush3.bf16.msra.mxu1 %v1149_v46 }
 0x19c   : > { %800 = vst.msk [vmem:[#allocation4 + $0x31] sm:$0xff] %vm769_vm13, %v763_v50  ;;  %v764_v0 = vmax.f32 %v742_v51, 0.0 }
 0x19d   : > { %798 = vst.msk [vmem:[#allocation4 + $0x11] sm:$0xff] %vm769_vm13, %v761_v53  ;;  %v762_v55 = vmax.f32 %v734_v54, 0.0 }
 0x19e   : > { %801 = vst.msk [vmem:[#allocation4 + $0x41] sm:$0xff] %vm769_vm13, %v764_v0 }
 0x19f   : > { %799 = vst.msk [vmem:[#allocation4 + $0x21] sm:$0xff] %vm769_vm13, %v762_v55 }
 0x1a3   : > { %v890_v61 = vld [vmem:[#allocation4 + $0x30] sm:$0xff] }
 0x1a4   : > { %v823_v58 = vld [vmem:[#allocation4 + $0x11] sm:$0xff] }
 0x1a5   : > { %v888_v59 = vld [vmem:[#allocation4 + $0x10] sm:$0xff]  ;;  %v830_v60 = vpack.c.bf16 %v823_v58, %v822_v56  ;;  %v1740_v62 = vld [vmem:[#allocation4 + $0x40] sm:$0xff] }
 0x1a6   : > { %v814_v63 = vpack.c.bf16 %v888_v59, %v806_v57  ;;  %v897_v1 = vpack.c.bf16 %v1740_v62, %v890_v61  ;;  %v856_v3 = vld [vmem:[#allocation4 + $0x12] sm:$0xff]  ;;  %v889_v4 = vld [vmem:[#allocation4 + $0x20] sm:$0xff] }
 0x1a7   : > { %838 = vrot.lane.b32.xlu0 %v830_v60, %s1423_s26  ;;  %v1744_v5 = vld [vmem:[#allocation4 + $0x41] sm:$0xff]  ;;  %v996_v6 = vpack.c.bf16 %v890_v61, %v889_v4  ;;  %v863_v7 = vpack.c.bf16 %v856_v3, %v855_v2  ;;  %v923_v8 = vld [vmem:[#allocation4 + $0x31] sm:$0xff]  ;;  %v896_v11 = vpack.c.bf16 %v889_v4, %v888_v59 }
 0x1a8   : > { %818 = vst.msk [vmem:[#allocation6] sm:$0xff] %vm769_vm13, %v814_v63  ;;  %906 = vrot.lane.b32.xlu1 %v897_v1, %s1427_s9  ;;  %v930_v9 = vpack.c.bf16 %v1744_v5, %v923_v8  ;;  %v1751_v10 = vld [vmem:[#allocation4 + $0x42] sm:$0xff]  ;;  %v956_v12 = vld [vmem:[#allocation4 + $0x32] sm:$0xff] }
 0x1a9   : > { %819 = vst.msk [vmem:[#allocation6 + $0x8] sm:$0xff] %vm769_vm13, %v996_v6  ;;  %v963_v13 = vpack.c.bf16 %v1751_v10, %v956_v12  ;;  %v922_v14 = vld [vmem:[#allocation4 + $0x21] sm:$0xff]  ;;  %v995_v59 = vld [vmem:[#allocation4 + $0x90] sm:$0xff] }
 0x1aa   : > { %v929_v16 = vpack.c.bf16 %v922_v14, %v823_v58  ;;  %v831_v17 = vpack.c.bf16 %v923_v8, %v922_v14  ;;  %v955_v18 = vld [vmem:[#allocation4 + $0x22] sm:$0xff]  ;;  %v1028_v63 = vld [vmem:[#allocation4 + $0x91] sm:$0xff] }
 0x1ab   : > { %871 = vrot.lane.b32.xlu0 %v863_v7, %s1425_s28  ;;  %v962_v23 = vpack.c.bf16 %v955_v18, %v856_v3  ;;  %v864_v26 = vpack.c.bf16 %v956_v12, %v955_v18  ;;  %v1061_v2 = vld [vmem:[#allocation4 + $0x92] sm:$0xff] }
 0x1ac   : > { %939 = vrot.lane.b32.xlu1 %v930_v9, %s1429_s13 }
 0x1af   : > { %904 = vrot.lane.b32.xlu0 %v896_v11, %s1427_s9 }
 0x1b0   : > { %972 = vrot.lane.b32.xlu1 %v963_v13, %s1430_s20 }
 0x1b3   : > { %937 = vrot.lane.b32.xlu0 %v929_v16, %s1429_s13 }
 0x1b4   : > { %v1362_v20 = vpop.f32.mrb[4].mxu0  ;;  %840 = vrot.lane.b32.xlu1 %v831_v17, %s1423_s26 }
 0x1b5   : > { %v755_v21 = vadd.f32 %v1362_v20, %v1730_v44  ;;  %v746_v22 = vpop.f32.mrb[5].mxu0 }
 0x1b6   : > { %v747_v24 = vadd.f32 %v1730_v44, %v746_v22  ;;  %v1363_v25 = vpop.f32.mrb[6].mxu0 }
 0x1b7   : > { %v767_v27 = vmax.f32 %v755_v21, 0.0  ;;  %v758_v28 = vadd.f32 %v1363_v25, %v1730_v44  ;;  %v749_v29 = vpop.f32.mrb[7].mxu0  ;;  %970 = vrot.lane.b32.xlu0 %v962_v23, %s1430_s20 }
 0x1b8   : > { %v765_v31 = vmax.f32 %v747_v24, 0.0  ;;  %v750_v32 = vadd.f32 %v1730_v44, %v749_v29  ;;  %873 = vrot.lane.b32.xlu1 %v864_v26, %s1425_s28 }
 0x1b9   : > { %804 = vst.msk [vmem:[#allocation4 + $0x71] sm:$0xff] %vm769_vm13, %v767_v27  ;;  %v768_v33 = vmax.f32 %v758_v28, 0.0 }
 0x1ba   : > { %802 = vst.msk [vmem:[#allocation4 + $0x51] sm:$0xff] %vm769_vm13, %v765_v31  ;;  %v766_v34 = vmax.f32 %v750_v32, 0.0 }
 0x1bb   : > { %805 = vst.msk [vmem:[#allocation4 + $0x81] sm:$0xff] %vm769_vm13, %v768_v33  ;;  %1004 = vrot.lane.b32.xlu0 %v996_v6, %s1431_s25 }
 0x1bc   : > { %803 = vst.msk [vmem:[#allocation4 + $0x61] sm:$0xff] %vm769_vm13, %v766_v34 }
 0x1bf   : > { %1037 = vrot.lane.b32.xlu0 %v831_v17, %s1432_s30 }
 0x1c0   : > { %v894_v41 = vld [vmem:[#allocation4 + $0x70] sm:$0xff] }
 0x1c1   : > { %v991_v36 = vld [vmem:[#allocation4 + $0x50] sm:$0xff] }
 0x1c2   : > { %v997_v37 = vpack.c.bf16 %v991_v36, %v1740_v62  ;;  %v1057_v38 = vld [vmem:[#allocation4 + $0x52] sm:$0xff]  ;;  %v895_v47 = vld [vmem:[#allocation4 + $0x80] sm:$0xff] }
 0x1c3   : > { %1070 = vrot.lane.b32.xlu0 %v864_v26, %s1433_s6  ;;  %v1024_v39 = vld [vmem:[#allocation4 + $0x51] sm:$0xff]  ;;  %v893_v40 = vld [vmem:[#allocation4 + $0x60] sm:$0xff]  ;;  %v1063_v44 = vpack.c.bf16 %v1057_v38, %v1751_v10  ;;  %v899_v49 = vpack.c.bf16 %v895_v47, %v894_v41  ;;  %v999_v60 = vpack.c.bf16 %v995_v59, %v895_v47 }
 0x1c4   : > { %1006 = vrot.lane.b32.xlu1 %v997_v37, %s1431_s25  ;;  %v998_v42 = vpack.c.bf16 %v894_v41, %v893_v40  ;;  %820 = vst.msk [vmem:[#allocation6 + $0x10] sm:$0xff] %vm769_vm13, %v997_v37  ;;  %v1030_v45 = vpack.c.bf16 %v1024_v39, %v1744_v5  ;;  %v898_v48 = vpack.c.bf16 %v893_v40, %v991_v36  ;;  %v926_v50 = vld [vmem:[#allocation4 + $0x61] sm:$0xff]  ;;  %v927_v53 = vld [vmem:[#allocation4 + $0x71] sm:$0xff]  ;;  %v1320_v40 = vld [vmem:[%s1869_s4] ss:$0 sm:$0xff] }
 0x1c5   : > { %v928_v51 = vld [vmem:[#allocation4 + $0x81] sm:$0xff]  ;;  %v931_v52 = vpack.c.bf16 %v926_v50, %v1024_v39  ;;  %v960_v57 = vld [vmem:[#allocation4 + $0x72] sm:$0xff]  ;;  %v1031_v61 = vpack.c.bf16 %v927_v53, %v926_v50 }
 0x1c6   : > { %821 = vst.msk [vmem:[#allocation6 + $0x18] sm:$0xff] %vm769_vm13, %v998_v42  ;;  %v932_v54 = vpack.c.bf16 %v928_v51, %v927_v53  ;;  %v959_v0 = vld [vmem:[#allocation4 + $0x62] sm:$0xff]  ;;  %v1032_v1 = vpack.c.bf16 %v1028_v63, %v928_v51 }
 0x1c7   : > { %1072 = vrot.lane.b32.xlu0 %v1063_v44, %s1433_s6  ;;  %v961_v55 = vld [vmem:[#allocation4 + $0x82] sm:$0xff]  ;;  %v964_v56 = vpack.c.bf16 %v959_v0, %v1057_v38  ;;  %v1064_v62 = vpack.c.bf16 %v960_v57, %v959_v0 }
 0x1c8   : > { %1039 = vrot.lane.b32.xlu1 %v1030_v45, %s1432_s30  ;;  %v965_v58 = vpack.c.bf16 %v961_v55, %v960_v57  ;;  %v1065_v3 = vpack.c.bf16 %v1061_v2, %v961_v55 }
 0x1cb   : > { %875 = vrot.lane.b32.xlu0 %v1063_v44, %s1425_s28 }
 0x1cc   : > { %842 = vrot.lane.b32.xlu1 %v1030_v45, %s1423_s26 }
 0x1cf   : > { %908 = vrot.lane.b32.xlu0 %v898_v48, %s1427_s9 }
 0x1d0   : > { %910 = vrot.lane.b32.xlu1 %v899_v49, %s1427_s9  ;;  %s1333_s9 = sshll.u32 %s1873_s19, 6 }
 0x1d1   : > { %s224_s12 = scalar_lea.vmem %s1870_s5, %s1333_s9 }
 0x1d3   : > { %941 = vrot.lane.b32.xlu0 %v931_v52, %s1429_s13 }
 0x1d4   : > { %943 = vrot.lane.b32.xlu1 %v932_v54, %s1429_s13 }
 0x1d7   : > { %974 = vrot.lane.b32.xlu0 %v964_v56, %s1430_s20 }
 0x1d8   : > { %976 = vrot.lane.b32.xlu1 %v965_v58, %s1430_s20 }
 0x1db   : > { %1008 = vrot.lane.b32.xlu0 %v998_v42, %s1431_s25 }
 0x1dc   : > { %1010 = vrot.lane.b32.xlu1 %v999_v60, %s1431_s25 }
 0x1df   : > { %1041 = vrot.lane.b32.xlu0 %v1031_v61, %s1432_s30 }
 0x1e0   : > { %844 = vrot.lane.b32.xlu1 %v1031_v61, %s1423_s26 }
 0x1e3   : > { %1074 = vrot.lane.b32.xlu0 %v1064_v62, %s1433_s6 }
 0x1e4   : > { %877 = vrot.lane.b32.xlu1 %v1064_v62, %s1425_s28 }
 0x1e8   : > { %1043 = vrot.lane.b32.xlu1 %v1032_v1, %s1432_s30 }
 0x1ec   : > { %1076 = vrot.lane.b32.xlu1 %v1065_v3, %s1433_s6 }
 0x219   : > { %v839_v4 = vpop.permute.xlu0 %838 }
 0x21a   : > { %851 = vst.msk [vmem:[#allocation6] sm:$0xff] %vm850_vm1, %v839_v4  ;;  %v907_v5 = vpop.permute.xlu1 %906 }
 0x21d   : > { %v872_v6 = vpop.permute.xlu0 %871 }
 0x21e   : > { %884 = vst.msk [vmem:[#allocation6] sm:$0xff] %vm883_vm2, %v872_v6  ;;  %v940_v7 = vpop.permute.xlu1 %939 }
 0x221   : > { %v905_v8 = vpop.permute.xlu0 %904 }
 0x222   : > { %917 = vst.msk [vmem:[#allocation6] sm:$0xff] %vm916_vm3, %v905_v8  ;;  %v973_v9 = vpop.permute.xlu1 %972 }
 0x225   : > { %v938_v10 = vpop.permute.xlu0 %937 }
 0x226   : > { %950 = vst.msk [vmem:[#allocation6] sm:$0xff] %vm949_vm4, %v938_v10  ;;  %v841_v11 = vpop.permute.xlu1 %840 }
 0x227   : > { %852 = vst.msk [vmem:[#allocation6 + $0x8] sm:$0xff] %vm850_vm1, %v841_v11 }
 0x229   : > { %v971_v12 = vpop.permute.xlu0 %970 }
 0x22a   : > { %983 = vst.msk [vmem:[#allocation6] sm:$0xff] %vm982_vm5, %v971_v12  ;;  %v874_v13 = vpop.permute.xlu1 %873 }
 0x22b   : > { %885 = vst.msk [vmem:[#allocation6 + $0x8] sm:$0xff] %vm883_vm2, %v874_v13 }
 0x22c   : > { %918 = vst.msk [vmem:[#allocation6 + $0x8] sm:$0xff] %vm916_vm3, %v907_v5 }
 0x22d   : > { %951 = vst.msk [vmem:[#allocation6 + $0x8] sm:$0xff] %vm949_vm4, %v940_v7  ;;  %v1005_v14 = vpop.permute.xlu0 %1004 }
 0x22e   : > { %1017 = vst.msk [vmem:[#allocation6] sm:$0xff] %vm1016_vm6, %v1005_v14 }
 0x22f   : > { %984 = vst.msk [vmem:[#allocation6 + $0x8] sm:$0xff] %vm982_vm5, %v973_v9 }
 0x231   : > { %v1038_v15 = vpop.permute.xlu0 %1037 }
 0x232   : > { %1050 = vst.msk [vmem:[#allocation6] sm:$0xff] %vm1049_vm7, %v1038_v15 }
 0x235   : > { %v1071_v16 = vpop.permute.xlu0 %1070 }
 0x236   : > { %1083 = vst.msk [vmem:[#allocation6] sm:$0xff] %vm1082_vm8, %v1071_v16  ;;  %v1007_v17 = vpop.permute.xlu1 %1006 }
 0x237   : > { %1018 = vst.msk [vmem:[#allocation6 + $0x8] sm:$0xff] %vm1016_vm6, %v1007_v17 }
 0x239   : > { %v1073_v18 = vpop.permute.xlu0 %1072 }
 0x23a   : > { %v1040_v19 = vpop.permute.xlu1 %1039 }
 0x23b   : > { %1051 = vst.msk [vmem:[#allocation6 + $0x8] sm:$0xff] %vm1049_vm7, %v1040_v19 }
 0x23c   : > { %1084 = vst.msk [vmem:[#allocation6 + $0x8] sm:$0xff] %vm1082_vm8, %v1073_v18 }
 0x23d   : > { %v876_v20 = vpop.permute.xlu0 %875  ;;  %v1087_v21 = vld [vmem:[#allocation6] sm:$0xff] }
 0x23e   : > { %v843_v22 = vpop.permute.xlu1 %842  ;;  %1374 = vmatprep.mubr.msk.bf16.mxu1 %vm1134_vm9, %v1087_v21 }
 0x23f   : > { %853 = vst.msk [vmem:[#allocation6 + $0x10] sm:$0xff] %vm850_vm1, %v843_v22 }
 0x240   : > { %886 = vst.msk [vmem:[#allocation6 + $0x10] sm:$0xff] %vm883_vm2, %v876_v20 }
 0x241   : > { %v909_v23 = vpop.permute.xlu0 %908 }
 0x242   : > { %919 = vst.msk [vmem:[#allocation6 + $0x10] sm:$0xff] %vm916_vm3, %v909_v23  ;;  %v911_v24 = vpop.permute.xlu1 %910 }
 0x243   : > { %v1088_v25 = vld [vmem:[#allocation6 + $0x8] sm:$0xff] }
 0x244   : > { %1375 = vmatmul.mubr.msk.bf16.vlgmr.msra.gmra.mrb[0].mxu1 %vm1134_vm9, %v1088_v25 }
 0x245   : > { %v942_v26 = vpop.permute.xlu0 %941 }
 0x246   : > { %952 = vst.msk [vmem:[#allocation6 + $0x10] sm:$0xff] %vm949_vm4, %v942_v26  ;;  %v944_v27 = vpop.permute.xlu1 %943 }
 0x249   : > { %v975_v28 = vpop.permute.xlu0 %974 }
 0x24a   : > { %985 = vst.msk [vmem:[#allocation6 + $0x10] sm:$0xff] %vm982_vm5, %v975_v28  ;;  %v977_v29 = vpop.permute.xlu1 %976 }
 0x24d   : > { %v1009_v30 = vpop.permute.xlu0 %1008 }
 0x24e   : > { %1019 = vst.msk [vmem:[#allocation6 + $0x10] sm:$0xff] %vm1016_vm6, %v1009_v30  ;;  %v1011_v31 = vpop.permute.xlu1 %1010 }
 0x251   : > { %v1042_v32 = vpop.permute.xlu0 %1041 }
 0x252   : > { %1052 = vst.msk [vmem:[#allocation6 + $0x10] sm:$0xff] %vm1049_vm7, %v1042_v32  ;;  %v845_v33 = vpop.permute.xlu1 %844 }
 0x253   : > { %854 = vst.msk [vmem:[#allocation6 + $0x18] sm:$0xff] %vm850_vm1, %v845_v33 }
 0x255   : > { %v1075_v34 = vpop.permute.xlu0 %1074 }
 0x256   : > { %1085 = vst.msk [vmem:[#allocation6 + $0x10] sm:$0xff] %vm1082_vm8, %v1075_v34  ;;  %v878_v35 = vpop.permute.xlu1 %877 }
 0x257   : > { %887 = vst.msk [vmem:[#allocation6 + $0x18] sm:$0xff] %vm883_vm2, %v878_v35 }
 0x258   : > { %920 = vst.msk [vmem:[#allocation6 + $0x18] sm:$0xff] %vm916_vm3, %v911_v24 }
 0x259   : > { %953 = vst.msk [vmem:[#allocation6 + $0x18] sm:$0xff] %vm949_vm4, %v944_v27 }
 0x25a   : > { %986 = vst.msk [vmem:[#allocation6 + $0x18] sm:$0xff] %vm982_vm5, %v977_v29  ;;  %v1044_v36 = vpop.permute.xlu1 %1043 }
 0x25b   : > { %1020 = vst.msk [vmem:[#allocation6 + $0x18] sm:$0xff] %vm1016_vm6, %v1011_v31 }
 0x25c   : > { %1053 = vst.msk [vmem:[#allocation6 + $0x18] sm:$0xff] %vm1049_vm7, %v1044_v36 }
 0x25d   : > { %v1089_v37 = vld [vmem:[#allocation6 + $0x10] sm:$0xff] }
 0x25e   : > { %v1077_v38 = vpop.permute.xlu1 %1076  ;;  %1378 = vmatprep.mubr.msk.bf16.mxu1 %vm1134_vm9, %v1089_v37 }
 0x25f   : > { %1086 = vst.msk [vmem:[#allocation6 + $0x18] sm:$0xff] %vm1082_vm8, %v1077_v38 }
 0x266   : > { %v1090_v39 = vld [vmem:[#allocation6 + $0x18] sm:$0xff] }
 0x267   : > { %1379 = vmatmul.mubr.msk.bf16.gmra.mrb[4].mxu1 %vm1134_vm9, %v1090_v39 }
 0x317   : > { %v1376_v41 = vpop.f32.mrb[0].mxu1 }
 0x318   : > { %v1194_v42 = vadd.f32 %v1376_v41, %v1320_v40  ;;  %v1185_v43 = vpop.f32.mrb[1].mxu1 }
 0x319   : > { %v1186_v44 = vadd.f32 %v1320_v40, %v1185_v43  ;;  %v1377_v45 = vpop.f32.mrb[2].mxu1 }
 0x31a   : > { %v1218_v46 = vmax.f32 %v1194_v42, 0.0  ;;  %v1197_v47 = vadd.f32 %v1377_v45, %v1320_v40  ;;  %v1188_v48 = vpop.f32.mrb[3].mxu1 }
 0x31b   : > { %v1216_v49 = vmax.f32 %v1186_v44, 0.0  ;;  %v1189_v50 = vadd.f32 %v1320_v40, %v1188_v48 }
 0x31c   : > { %1226 = vst.msk [vmem:[%s224_s12 + $0x10] sm:$0xff] %vm769_vm13, %v1218_v46  ;;  %v1219_v51 = vmax.f32 %v1197_v47, 0.0 }
 0x31d   : > { %1224 = vst.msk [vmem:[%s224_s12] sm:$0xff] %vm769_vm13, %v1216_v49  ;;  %v1217_v52 = vmax.f32 %v1189_v50, 0.0 }
 0x31e   : > { %1227 = vst.msk [vmem:[%s224_s12 + $0x18] sm:$0xff] %vm769_vm13, %v1219_v51 }
 0x31f   : > { %1225 = vst.msk [vmem:[%s224_s12 + $0x8] sm:$0xff] %vm769_vm13, %v1217_v52 }
 0x33a   : > { %v1380_v53 = vpop.f32.mrb[4].mxu1 }
 0x33b   : > { %v1210_v54 = vadd.f32 %v1380_v53, %v1320_v40  ;;  %v1201_v0 = vpop.f32.mrb[5].mxu1 }
 0x33c   : > { %v1202_v55 = vadd.f32 %v1320_v40, %v1201_v0  ;;  %v1381_v56 = vpop.f32.mrb[6].mxu1 }
 0x33d   : > { %v1222_v57 = vmax.f32 %v1210_v54, 0.0  ;;  %v1213_v58 = vadd.f32 %v1381_v56, %v1320_v40  ;;  %v1204_v59 = vpop.f32.mrb[7].mxu1 }
 0x33e   : > { %v1220_v60 = vmax.f32 %v1202_v55, 0.0  ;;  %v1205_v61 = vadd.f32 %v1320_v40, %v1204_v59 }
 0x33f   : > { %1230 = vst.msk [vmem:[%s224_s12 + $0x30] sm:$0xff] %vm769_vm13, %v1222_v57  ;;  %v1223_v62 = vmax.f32 %v1213_v58, 0.0 }
 0x340   : > { %1228 = vst.msk [vmem:[%s224_s12 + $0x20] sm:$0xff] %vm769_vm13, %v1220_v60  ;;  %v1221_v63 = vmax.f32 %v1205_v61, 0.0 }
 0x341   : > { %1231 = vst.msk [vmem:[%s224_s12 + $0x38] sm:$0xff] %vm769_vm13, %v1223_v62 }
 0x342   : > { %1229 = vst.msk [vmem:[%s224_s12 + $0x28] sm:$0xff] %vm769_vm13, %v1221_v63 }
 0x343 PF: > { %s15_s18 = sadd.s32 1, %s1419_s18  }
 0x344   : > { %p12_p4 = scmp.ge.s32.totalorder %s15_s18, 4  }
 0x346   :  { %14 = sbr.rel (!%p12_p4) target bundleno = 1 (0x1), region = 92 }

</bundles_post_ra>
